<compile_context>
chip_gen: v5e
topology: v5e:2x2
jax: 0.10.0
libtpu: 0.0.40
codegen_flags: <defaults>
</compile_context>

<pallas_src>
import jax
import jax.numpy as jnp
import numpy as np
from jax.experimental import pallas as pl
from jax.experimental.pallas import tpu as pltpu


# ----------------------------------------------------------------------------
# Pallas kernels
# ----------------------------------------------------------------------------
def _dense_kernel(x_ref, w_ref, b_ref, o_ref):
    """stride == 1 path:  relu(x @ W_folded + b_folded)  (x, W in bf16)."""
    h = jnp.dot(x_ref[...], w_ref[...], preferred_element_type=jnp.float32)
    o_ref[...] = jnp.maximum(h + b_ref[...], 0.0)


def _group_kernel(gx_ref, gf_ref, wf_ref, wx_ref, b_ref, o_ref):
    """stride != 1 path.

    gx_ref: (tm, 3*K)      f32   relative xyz, flattened neighbour-major per row
    gf_ref: (K, tm, C_in)  bf16  gathered neighbour features, neighbour-major
    wf_ref: (C_in, C_out)  bf16  folded weight rows for the feature channels
    wx_ref: (3, C_out)     f32   folded weight rows for the xyz channels
    b_ref : (1, C_out)     f32   folded bias
    o_ref : (tm, C_out)    f32   max_k relu(feat_k @ Wf + xyz_k @ Wx + b)
    """
    nk = gf_ref.shape[0]
    wf = wf_ref[...]
    bias = b_ref[...]
    wx0 = wx_ref[0:1, :]
    wx1 = wx_ref[1:2, :]
    wx2 = wx_ref[2:3, :]
    best = None
    for k in range(nk):                      # unrolled: K is small and static
        hf = jnp.dot(gf_ref[k], wf, preferred_element_type=jnp.float32)
        hx = (gx_ref[:, 3 * k + 0:3 * k + 1] * wx0
              + gx_ref[:, 3 * k + 1:3 * k + 2] * wx1
              + gx_ref[:, 3 * k + 2:3 * k + 3] * wx2)
        h = jnp.maximum(hf + hx + bias, 0.0)
        best = h if best is None else jnp.maximum(best, h)
    o_ref[...] = best


# ----------------------------------------------------------------------------
# Tiling helpers
# ----------------------------------------------------------------------------
def _cdiv(a, b):
    return (a + b - 1) // b


def _round_up(x, m):
    return _cdiv(x, m) * m


def _choose_tile(rows, tm_target, min_steps=2):
    """Balanced, 8-aligned row tile; grid >= min_steps whenever rows allow it."""
    steps = max(min_steps, _cdiv(rows, tm_target)) if rows > 8 else 1
    tm = max(8, _round_up(_cdiv(rows, steps), 8))
    padded = _round_up(max(rows, 1), tm)
    return tm, padded


# ----------------------------------------------------------------------------
# pallas_call wrappers
# ----------------------------------------------------------------------------
def _dense_forward(x2, w, b, *, tm_target=2048):
    rows, cin = x2.shape
    cout = w.shape[1]
    tm, padded = _choose_tile(rows, tm_target)
    if padded != rows:
        x2 = jnp.pad(x2, ((0, padded - rows), (0, 0)))
    out = pl.pallas_call(
        _dense_kernel,
        out_shape=jax.ShapeDtypeStruct((padded, cout), jnp.float32),
        grid_spec=pltpu.PrefetchScalarGridSpec(
            num_scalar_prefetch=0,
            grid=(padded // tm,),
            in_specs=[pl.BlockSpec((tm, cin), lambda i: (i, 0)),
                      pl.BlockSpec((cin, cout), lambda i: (0, 0)),
                      pl.BlockSpec((1, cout), lambda i: (0, 0))],
            out_specs=pl.BlockSpec((tm, cout), lambda i: (i, 0))),
        compiler_params=pltpu.CompilerParams(dimension_semantics=("parallel",)),
    )(x2, w, b)
    return out[:rows]


def _grouped_forward(gx2, gfk, wf, wx, b, *, tm_target=512):
    """gx2: (rows, 3*K) f32 ; gfk: (K, rows, C_in) bf16."""
    rows = gx2.shape[0]
    tm, padded = _choose_tile(rows, tm_target)
    if padded != rows:
        gx2 = jnp.pad(gx2, ((0, padded - rows), (0, 0)))
        gfk = jnp.pad(gfk, ((0, 0), (0, padded - rows), (0, 0)))
    k = gfk.shape[0]
    cin = gfk.shape[2]
    cout = wf.shape[1]
    three_k = gx2.shape[1]
    out = pl.pallas_call(
        _group_kernel,
        out_shape=jax.ShapeDtypeStruct((padded, cout), jnp.float32),
        grid_spec=pltpu.PrefetchScalarGridSpec(
            num_scalar_prefetch=0,
            grid=(padded // tm,),
            in_specs=[pl.BlockSpec((tm, three_k), lambda i: (i, 0)),
                      pl.BlockSpec((k, tm, cin), lambda i: (0, i, 0)),
                      pl.BlockSpec((cin, cout), lambda i: (0, 0)),
                      pl.BlockSpec((3, cout), lambda i: (0, 0)),
                      pl.BlockSpec((1, cout), lambda i: (0, 0))],
            out_specs=pl.BlockSpec((tm, cout), lambda i: (i, 0))),
        compiler_params=pltpu.CompilerParams(dimension_semantics=("parallel",)),
    )(gx2, gfk, wf, wx, b)
    return out[:rows]


# ----------------------------------------------------------------------------
# Index glue in plain JAX (FPS / kNN / gather)
# ----------------------------------------------------------------------------
def index_points(points, idx):
    """points: (B, N, C); idx: (B, ...) int -> (B, ..., C)."""
    b = points.shape[0]
    raw = idx.shape
    flat = idx.reshape(b, -1)
    out = jnp.take_along_axis(points, flat[..., None], axis=1)
    return out.reshape(*raw, points.shape[-1])


def farthest_point_sampling(xyz, npoint):
    """Deterministic FPS starting from point 0 of each cloud."""
    def one(pts):
        n = pts.shape[0]

        def body(i, carry):
            dist, idxs = carry
            last = pts[idxs[i - 1]]
            d = jnp.sum((pts - last) ** 2, axis=-1)
            dist = jnp.minimum(dist, d)
            idxs = idxs.at[i].set(jnp.argmax(dist).astype(jnp.int32))
            return dist, idxs

        dist0 = jnp.full((n,), jnp.inf, dtype=pts.dtype)
        idxs0 = jnp.zeros((npoint,), dtype=jnp.int32)
        _, idxs = jax.lax.fori_loop(1, npoint, body, (dist0, idxs0))
        return idxs

    return jax.vmap(one)(xyz)


def knn_query(k, xyz, new_xyz):
    """k nearest neighbours (by squared distance) of each new_xyz point in xyz."""
    d2 = jnp.sum((new_xyz[:, :, None, :] - xyz[:, None, :, :]) ** 2, axis=-1)
    _, idx = jax.lax.top_k(-d2, k)           # top_k instead of full argsort
    return idx.astype(jnp.int32)


# ----------------------------------------------------------------------------
# Parameters (deterministic synthetic) and BN folding
# ----------------------------------------------------------------------------
def init_params(key, in_planes, out_planes, stride, eps=1e-5):
    d = in_planes + (3 if stride != 1 else 0)
    k1, k2, k3, k4, k5 = jax.random.split(key, 5)
    w = 0.1 * jax.random.normal(k1, (d, out_planes), dtype=jnp.float32)
    gamma = 1.0 + 0.1 * jax.random.normal(k2, (out_planes,), dtype=jnp.float32)
    beta = 0.1 * jax.random.normal(k3, (out_planes,), dtype=jnp.float32)
    mean = 0.1 * jax.random.normal(k4, (out_planes,), dtype=jnp.float32)
    var = 0.5 + jax.random.uniform(k5, (out_planes,), dtype=jnp.float32)
    return {'w': w, 'gamma': gamma, 'beta': beta, 'mean': mean, 'var': var,
            'eps': eps}


def fold_bn_into_linear(p):
    """Eval-mode BN folded into the (bias-free) linear:  y = x @ W' + b'."""
    scale = p['gamma'] / jnp.sqrt(p['var'] + p['eps'])
    w_f = p['w'] * scale[None, :]
    b_f = (p['beta'] - p['mean'] * scale)[None, :]
    return w_f, b_f


# ----------------------------------------------------------------------------
# TransitionDown forward
# ----------------------------------------------------------------------------
def transition_down(xyz, features, params, *, stride, nneighbor=16):
    """Forward pass of TransitionDown.  Returns [new_xyz, new_features]."""
    w_f, b_f = fold_bn_into_linear(params)
    b, n, _ = xyz.shape

    if stride == 1:
        rows = b * n
        x2 = features.reshape(rows, features.shape[-1]).astype(jnp.bfloat16)
        out = _dense_forward(x2, w_f.astype(jnp.bfloat16), b_f)
        return xyz, out.reshape(b, n, -1)

    npoint = n // stride
    k = min(nneighbor, n)
    fps_idx = farthest_point_sampling(xyz, npoint)             # (B, S)
    new_xyz = index_points(xyz, fps_idx)                       # (B, S, 3)
    knn_idx = knn_query(k, xyz, new_xyz)                       # (B, S, K)

    rows = b * npoint
    # relative coordinates, kept in f32, flattened to (rows, 3*K)
    grouped_xyz = index_points(xyz, knn_idx)                   # (B, S, K, 3)
    rel_xyz = grouped_xyz - new_xyz[:, :, None, :]
    gx2 = rel_xyz.reshape(rows, k * 3)
    # gathered neighbour features in bf16 (halves gather write + kernel read),
    # neighbour-major layout (K, rows, C_in) for contiguous per-k slabs.
    gfeat = index_points(features.astype(jnp.bfloat16), knn_idx)   # (B, S, K, C)
    gfk = jnp.transpose(gfeat, (2, 0, 1, 3)).reshape(k, rows, -1)

    wx = w_f[:3]                              # (3, C_out)  f32, VPU path
    wf = w_f[3:].astype(jnp.bfloat16)         # (C_in, C_out) bf16, MXU path
    out = _grouped_forward(gx2, gfk, wf, wx, b_f)
    return new_xyz, out.reshape(b, npoint, -1)


# ----------------------------------------------------------------------------
# Pure-JAX reference (unfolded BN, f32, same index glue) for correctness check
# ----------------------------------------------------------------------------
def reference_transition_down(xyz, features, params, *, stride, nneighbor=16):
    scale = params['gamma'] / jnp.sqrt(params['var'] + params['eps'])
    shift = params['beta'] - params['mean'] * scale
    mm = lambda a, w: jnp.matmul(a, w, precision=jax.lax.Precision.HIGHEST)
    bn_relu = lambda x: jnp.maximum(x * scale + shift, 0.0)
    b, n, _ = xyz.shape

    if stride == 1:
        return xyz, bn_relu(mm(features, params['w']))

    npoint = n // stride
    k = min(nneighbor, n)
    fps_idx = farthest_point_sampling(xyz, npoint)
    new_xyz = index_points(xyz, fps_idx)
    knn_idx = knn_query(k, xyz, new_xyz)
    grouped_xyz = index_points(xyz, knn_idx)
    grouped_xyz_norm = grouped_xyz - new_xyz[:, :, None, :]
    grouped_feat = index_points(features, knn_idx)
    grouped = jnp.concatenate([grouped_xyz_norm, grouped_feat], axis=-1)
    h = bn_relu(mm(grouped, params['w']))
    return new_xyz, jnp.max(h, axis=2)


# ----------------------------------------------------------------------------
if __name__ == "__main__":
    B, N = 2, 64
    IN_PLANES, OUT_PLANES = 32, 64
    STRIDE, NNEIGHBOR = 4, 16

    key = jax.random.PRNGKey(0)
    kx, kf, kp1, kp2 = jax.random.split(key, 4)
    xyz = jax.random.normal(kx, (B, N, 3), dtype=jnp.float32)
    feats = jax.random.normal(kf, (B, N, IN_PLANES), dtype=jnp.float32)

    # --- stride != 1 path (downsampling) ------------------------------------
    p_down = init_params(kp1, IN_PLANES, OUT_PLANES, STRIDE)
    new_xyz, new_feat = transition_down(xyz, feats, p_down,
                                        stride=STRIDE, nneighbor=NNEIGHBOR)
    new_feat = jax.block_until_ready(new_feat)
    ref_xyz, ref_feat = reference_transition_down(xyz, feats, p_down,
                                                  stride=STRIDE,
                                                  nneighbor=NNEIGHBOR)
    np.testing.assert_allclose(np.asarray(new_xyz), np.asarray(ref_xyz),
                               rtol=1e-6, atol=1e-6)
    # bf16 input streams vs f32 HIGHEST reference -> bf16-appropriate tolerance
    np.testing.assert_allclose(np.asarray(new_feat), np.asarray(ref_feat),
                               rtol=2e-2, atol=2e-2)

    # --- stride == 1 path (pointwise MLP) ------------------------------------
    p_same = init_params(kp2, IN_PLANES, OUT_PLANES, 1)
    _, same_feat = transition_down(xyz, feats, p_same,
                                   stride=1, nneighbor=NNEIGHBOR)
    same_feat = jax.block_until_ready(same_feat)
    _, ref_same = reference_transition_down(xyz, feats, p_same,
                                            stride=1, nneighbor=NNEIGHBOR)
    np.testing.assert_allclose(np.asarray(same_feat), np.asarray(ref_same),
                               rtol=2e-2, atol=2e-2)

    print("KERNEL_OK")
</pallas_src>

<mosaic_0001>
module attributes {stable_mosaic.version = 11 : i64} {
  func.func @_group_kernel(%arg0: i32, %arg1: memref<16x48xf32, #tpu.memory_space<vmem>>, %arg2: memref<16x16x32xbf16, #tpu.memory_space<vmem>>, %arg3: memref<32x64xbf16, #tpu.memory_space<vmem>>, %arg4: memref<3x64xf32, #tpu.memory_space<vmem>>, %arg5: memref<1x64xf32, #tpu.memory_space<vmem>>, %arg6: memref<16x64xf32, #tpu.memory_space<vmem>>) attributes {dimension_semantics = [#tpu.dimension_semantics<parallel>], iteration_bounds = array<i64: 2>, scalar_prefetch = 0 : i64, scratch_operands = 0 : i64, tpu.core_type = #tpu.core_type<tc>, window_params = [{transform_indices = @transform_0, window_bounds = array<i64: 16, 48>}, {transform_indices = @transform_1, window_bounds = array<i64: 16, 16, 32>}, {pipeline_mode = #tpu.pipeline_mode<synchronous>, transform_indices = @transform_2, window_bounds = array<i64: 32, 64>}, {pipeline_mode = #tpu.pipeline_mode<synchronous>, transform_indices = @transform_3, window_bounds = array<i64: 3, 64>}, {pipeline_mode = #tpu.pipeline_mode<synchronous>, transform_indices = @transform_4, window_bounds = array<i64: 1, 64>}, {transform_indices = @transform_5, window_bounds = array<i64: 16, 64>}]} {
    %c0 = arith.constant 0 : index
    %c0_0 = arith.constant 0 : index
    %0 = vector.load %arg3[%c0, %c0_0] : memref<32x64xbf16, #tpu.memory_space<vmem>>, vector<32x64xbf16>
    %c0_1 = arith.constant 0 : index
    %c0_2 = arith.constant 0 : index
    %1 = vector.load %arg5[%c0_1, %c0_2] : memref<1x64xf32, #tpu.memory_space<vmem>>, vector<1x64xf32>
    %c0_3 = arith.constant 0 : index
    %c0_4 = arith.constant 0 : index
    %2 = vector.load %arg4[%c0_3, %c0_4] : memref<3x64xf32, #tpu.memory_space<vmem>>, vector<1x64xf32>
    %c1 = arith.constant 1 : index
    %c0_5 = arith.constant 0 : index
    %3 = vector.load %arg4[%c1, %c0_5] : memref<3x64xf32, #tpu.memory_space<vmem>>, vector<1x64xf32>
    %c2 = arith.constant 2 : index
    %c0_6 = arith.constant 0 : index
    %4 = vector.load %arg4[%c2, %c0_6] : memref<3x64xf32, #tpu.memory_space<vmem>>, vector<1x64xf32>
    %c0_7 = arith.constant 0 : index
    %c0_8 = arith.constant 0 : index
    %c0_9 = arith.constant 0 : index
    %5 = vector.load %arg2[%c0_7, %c0_8, %c0_9] : memref<16x16x32xbf16, #tpu.memory_space<vmem>>, vector<1x16x32xbf16>
    %6 = vector.shape_cast %5 : vector<1x16x32xbf16> to vector<16x32xbf16>
    %cst = arith.constant dense<0.000000e+00> : vector<16x64xf32>
    %7 = tpu.matmul %6, %0, %cst {dimension_numbers = #tpu.dot_dimension_numbers<[1], [0], [0], [1], [0, 0, 1, 1], [], []>} : vector<16x32xbf16>, vector<32x64xbf16>, vector<16x64xf32> -> vector<16x64xf32>
    %c0_10 = arith.constant 0 : index
    %c0_11 = arith.constant 0 : index
    %8 = vector.load %arg1[%c0_10, %c0_11] : memref<16x48xf32, #tpu.memory_space<vmem>>, vector<16x1xf32>
    %9 = vector.broadcast %8 : vector<16x1xf32> to vector<16x64xf32>
    %10 = vector.broadcast %2 : vector<1x64xf32> to vector<16x64xf32>
    %11 = arith.mulf %9, %10 : vector<16x64xf32>
    %c0_12 = arith.constant 0 : index
    %c1_13 = arith.constant 1 : index
    %12 = vector.load %arg1[%c0_12, %c1_13] : memref<16x48xf32, #tpu.memory_space<vmem>>, vector<16x1xf32>
    %13 = vector.broadcast %12 : vector<16x1xf32> to vector<16x64xf32>
    %14 = vector.broadcast %3 : vector<1x64xf32> to vector<16x64xf32>
    %15 = arith.mulf %13, %14 : vector<16x64xf32>
    %16 = arith.addf %11, %15 : vector<16x64xf32>
    %c0_14 = arith.constant 0 : index
    %c2_15 = arith.constant 2 : index
    %17 = vector.load %arg1[%c0_14, %c2_15] : memref<16x48xf32, #tpu.memory_space<vmem>>, vector<16x1xf32>
    %18 = vector.broadcast %17 : vector<16x1xf32> to vector<16x64xf32>
    %19 = vector.broadcast %4 : vector<1x64xf32> to vector<16x64xf32>
    %20 = arith.mulf %18, %19 : vector<16x64xf32>
    %21 = arith.addf %16, %20 : vector<16x64xf32>
    %22 = arith.addf %7, %21 : vector<16x64xf32>
    %23 = vector.broadcast %1 : vector<1x64xf32> to vector<16x64xf32>
    %24 = arith.addf %22, %23 : vector<16x64xf32>
    %cst_16 = arith.constant 0.000000e+00 : f32
    %25 = vector.broadcast %cst_16 : f32 to vector<16x64xf32>
    %26 = arith.maximumf %24, %25 : vector<16x64xf32>
    %c1_17 = arith.constant 1 : index
    %c0_18 = arith.constant 0 : index
    %c0_19 = arith.constant 0 : index
    %27 = vector.load %arg2[%c1_17, %c0_18, %c0_19] : memref<16x16x32xbf16, #tpu.memory_space<vmem>>, vector<1x16x32xbf16>
    %28 = vector.shape_cast %27 : vector<1x16x32xbf16> to vector<16x32xbf16>
    %cst_20 = arith.constant dense<0.000000e+00> : vector<16x64xf32>
    %29 = tpu.matmul %28, %0, %cst_20 {dimension_numbers = #tpu.dot_dimension_numbers<[1], [0], [0], [1], [0, 0, 1, 1], [], []>} : vector<16x32xbf16>, vector<32x64xbf16>, vector<16x64xf32> -> vector<16x64xf32>
    %c0_21 = arith.constant 0 : index
    %c3 = arith.constant 3 : index
    %30 = vector.load %arg1[%c0_21, %c3] : memref<16x48xf32, #tpu.memory_space<vmem>>, vector<16x1xf32>
    %31 = vector.broadcast %30 : vector<16x1xf32> to vector<16x64xf32>
    %32 = vector.broadcast %2 : vector<1x64xf32> to vector<16x64xf32>
    %33 = arith.mulf %31, %32 : vector<16x64xf32>
    %c0_22 = arith.constant 0 : index
    %c4 = arith.constant 4 : index
    %34 = vector.load %arg1[%c0_22, %c4] : memref<16x48xf32, #tpu.memory_space<vmem>>, vector<16x1xf32>
    %35 = vector.broadcast %34 : vector<16x1xf32> to vector<16x64xf32>
    %36 = vector.broadcast %3 : vector<1x64xf32> to vector<16x64xf32>
    %37 = arith.mulf %35, %36 : vector<16x64xf32>
    %38 = arith.addf %33, %37 : vector<16x64xf32>
    %c0_23 = arith.constant 0 : index
    %c5 = arith.constant 5 : index
    %39 = vector.load %arg1[%c0_23, %c5] : memref<16x48xf32, #tpu.memory_space<vmem>>, vector<16x1xf32>
    %40 = vector.broadcast %39 : vector<16x1xf32> to vector<16x64xf32>
    %41 = vector.broadcast %4 : vector<1x64xf32> to vector<16x64xf32>
    %42 = arith.mulf %40, %41 : vector<16x64xf32>
    %43 = arith.addf %38, %42 : vector<16x64xf32>
    %44 = arith.addf %29, %43 : vector<16x64xf32>
    %45 = vector.broadcast %1 : vector<1x64xf32> to vector<16x64xf32>
    %46 = arith.addf %44, %45 : vector<16x64xf32>
    %cst_24 = arith.constant 0.000000e+00 : f32
    %47 = vector.broadcast %cst_24 : f32 to vector<16x64xf32>
    %48 = arith.maximumf %46, %47 : vector<16x64xf32>
    %49 = arith.maximumf %26, %48 : vector<16x64xf32>
    %c2_25 = arith.constant 2 : index
    %c0_26 = arith.constant 0 : index
    %c0_27 = arith.constant 0 : index
    %50 = vector.load %arg2[%c2_25, %c0_26, %c0_27] : memref<16x16x32xbf16, #tpu.memory_space<vmem>>, vector<1x16x32xbf16>
    %51 = vector.shape_cast %50 : vector<1x16x32xbf16> to vector<16x32xbf16>
    %cst_28 = arith.constant dense<0.000000e+00> : vector<16x64xf32>
    %52 = tpu.matmul %51, %0, %cst_28 {dimension_numbers = #tpu.dot_dimension_numbers<[1], [0], [0], [1], [0, 0, 1, 1], [], []>} : vector<16x32xbf16>, vector<32x64xbf16>, vector<16x64xf32> -> vector<16x64xf32>
    %c0_29 = arith.constant 0 : index
    %c6 = arith.constant 6 : index
    %53 = vector.load %arg1[%c0_29, %c6] : memref<16x48xf32, #tpu.memory_space<vmem>>, vector<16x1xf32>
    %54 = vector.broadcast %53 : vector<16x1xf32> to vector<16x64xf32>
    %55 = vector.broadcast %2 : vector<1x64xf32> to vector<16x64xf32>
    %56 = arith.mulf %54, %55 : vector<16x64xf32>
    %c0_30 = arith.constant 0 : index
    %c7 = arith.constant 7 : index
    %57 = vector.load %arg1[%c0_30, %c7] : memref<16x48xf32, #tpu.memory_space<vmem>>, vector<16x1xf32>
    %58 = vector.broadcast %57 : vector<16x1xf32> to vector<16x64xf32>
    %59 = vector.broadcast %3 : vector<1x64xf32> to vector<16x64xf32>
    %60 = arith.mulf %58, %59 : vector<16x64xf32>
    %61 = arith.addf %56, %60 : vector<16x64xf32>
    %c0_31 = arith.constant 0 : index
    %c8 = arith.constant 8 : index
    %62 = vector.load %arg1[%c0_31, %c8] : memref<16x48xf32, #tpu.memory_space<vmem>>, vector<16x1xf32>
    %63 = vector.broadcast %62 : vector<16x1xf32> to vector<16x64xf32>
    %64 = vector.broadcast %4 : vector<1x64xf32> to vector<16x64xf32>
    %65 = arith.mulf %63, %64 : vector<16x64xf32>
    %66 = arith.addf %61, %65 : vector<16x64xf32>
    %67 = arith.addf %52, %66 : vector<16x64xf32>
    %68 = vector.broadcast %1 : vector<1x64xf32> to vector<16x64xf32>
    %69 = arith.addf %67, %68 : vector<16x64xf32>
    %cst_32 = arith.constant 0.000000e+00 : f32
    %70 = vector.broadcast %cst_32 : f32 to vector<16x64xf32>
    %71 = arith.maximumf %69, %70 : vector<16x64xf32>
    %72 = arith.maximumf %49, %71 : vector<16x64xf32>
    %c3_33 = arith.constant 3 : index
    %c0_34 = arith.constant 0 : index
    %c0_35 = arith.constant 0 : index
    %73 = vector.load %arg2[%c3_33, %c0_34, %c0_35] : memref<16x16x32xbf16, #tpu.memory_space<vmem>>, vector<1x16x32xbf16>
    %74 = vector.shape_cast %73 : vector<1x16x32xbf16> to vector<16x32xbf16>
    %cst_36 = arith.constant dense<0.000000e+00> : vector<16x64xf32>
    %75 = tpu.matmul %74, %0, %cst_36 {dimension_numbers = #tpu.dot_dimension_numbers<[1], [0], [0], [1], [0, 0, 1, 1], [], []>} : vector<16x32xbf16>, vector<32x64xbf16>, vector<16x64xf32> -> vector<16x64xf32>
    %c0_37 = arith.constant 0 : index
    %c9 = arith.constant 9 : index
    %76 = vector.load %arg1[%c0_37, %c9] : memref<16x48xf32, #tpu.memory_space<vmem>>, vector<16x1xf32>
    %77 = vector.broadcast %76 : vector<16x1xf32> to vector<16x64xf32>
    %78 = vector.broadcast %2 : vector<1x64xf32> to vector<16x64xf32>
    %79 = arith.mulf %77, %78 : vector<16x64xf32>
    %c0_38 = arith.constant 0 : index
    %c10 = arith.constant 10 : index
    %80 = vector.load %arg1[%c0_38, %c10] : memref<16x48xf32, #tpu.memory_space<vmem>>, vector<16x1xf32>
    %81 = vector.broadcast %80 : vector<16x1xf32> to vector<16x64xf32>
    %82 = vector.broadcast %3 : vector<1x64xf32> to vector<16x64xf32>
    %83 = arith.mulf %81, %82 : vector<16x64xf32>
    %84 = arith.addf %79, %83 : vector<16x64xf32>
    %c0_39 = arith.constant 0 : index
    %c11 = arith.constant 11 : index
    %85 = vector.load %arg1[%c0_39, %c11] : memref<16x48xf32, #tpu.memory_space<vmem>>, vector<16x1xf32>
    %86 = vector.broadcast %85 : vector<16x1xf32> to vector<16x64xf32>
    %87 = vector.broadcast %4 : vector<1x64xf32> to vector<16x64xf32>
    %88 = arith.mulf %86, %87 : vector<16x64xf32>
    %89 = arith.addf %84, %88 : vector<16x64xf32>
    %90 = arith.addf %75, %89 : vector<16x64xf32>
    %91 = vector.broadcast %1 : vector<1x64xf32> to vector<16x64xf32>
    %92 = arith.addf %90, %91 : vector<16x64xf32>
    %cst_40 = arith.constant 0.000000e+00 : f32
    %93 = vector.broadcast %cst_40 : f32 to vector<16x64xf32>
    %94 = arith.maximumf %92, %93 : vector<16x64xf32>
    %95 = arith.maximumf %72, %94 : vector<16x64xf32>
    %c4_41 = arith.constant 4 : index
    %c0_42 = arith.constant 0 : index
    %c0_43 = arith.constant 0 : index
    %96 = vector.load %arg2[%c4_41, %c0_42, %c0_43] : memref<16x16x32xbf16, #tpu.memory_space<vmem>>, vector<1x16x32xbf16>
    %97 = vector.shape_cast %96 : vector<1x16x32xbf16> to vector<16x32xbf16>
    %cst_44 = arith.constant dense<0.000000e+00> : vector<16x64xf32>
    %98 = tpu.matmul %97, %0, %cst_44 {dimension_numbers = #tpu.dot_dimension_numbers<[1], [0], [0], [1], [0, 0, 1, 1], [], []>} : vector<16x32xbf16>, vector<32x64xbf16>, vector<16x64xf32> -> vector<16x64xf32>
    %c0_45 = arith.constant 0 : index
    %c12 = arith.constant 12 : index
    %99 = vector.load %arg1[%c0_45, %c12] : memref<16x48xf32, #tpu.memory_space<vmem>>, vector<16x1xf32>
    %100 = vector.broadcast %99 : vector<16x1xf32> to vector<16x64xf32>
    %101 = vector.broadcast %2 : vector<1x64xf32> to vector<16x64xf32>
    %102 = arith.mulf %100, %101 : vector<16x64xf32>
    %c0_46 = arith.constant 0 : index
    %c13 = arith.constant 13 : index
    %103 = vector.load %arg1[%c0_46, %c13] : memref<16x48xf32, #tpu.memory_space<vmem>>, vector<16x1xf32>
    %104 = vector.broadcast %103 : vector<16x1xf32> to vector<16x64xf32>
    %105 = vector.broadcast %3 : vector<1x64xf32> to vector<16x64xf32>
    %106 = arith.mulf %104, %105 : vector<16x64xf32>
    %107 = arith.addf %102, %106 : vector<16x64xf32>
    %c0_47 = arith.constant 0 : index
    %c14 = arith.constant 14 : index
    %108 = vector.load %arg1[%c0_47, %c14] : memref<16x48xf32, #tpu.memory_space<vmem>>, vector<16x1xf32>
    %109 = vector.broadcast %108 : vector<16x1xf32> to vector<16x64xf32>
    %110 = vector.broadcast %4 : vector<1x64xf32> to vector<16x64xf32>
    %111 = arith.mulf %109, %110 : vector<16x64xf32>
    %112 = arith.addf %107, %111 : vector<16x64xf32>
    %113 = arith.addf %98, %112 : vector<16x64xf32>
    %114 = vector.broadcast %1 : vector<1x64xf32> to vector<16x64xf32>
    %115 = arith.addf %113, %114 : vector<16x64xf32>
    %cst_48 = arith.constant 0.000000e+00 : f32
    %116 = vector.broadcast %cst_48 : f32 to vector<16x64xf32>
    %117 = arith.maximumf %115, %116 : vector<16x64xf32>
    %118 = arith.maximumf %95, %117 : vector<16x64xf32>
    %c5_49 = arith.constant 5 : index
    %c0_50 = arith.constant 0 : index
    %c0_51 = arith.constant 0 : index
    %119 = vector.load %arg2[%c5_49, %c0_50, %c0_51] : memref<16x16x32xbf16, #tpu.memory_space<vmem>>, vector<1x16x32xbf16>
    %120 = vector.shape_cast %119 : vector<1x16x32xbf16> to vector<16x32xbf16>
    %cst_52 = arith.constant dense<0.000000e+00> : vector<16x64xf32>
    %121 = tpu.matmul %120, %0, %cst_52 {dimension_numbers = #tpu.dot_dimension_numbers<[1], [0], [0], [1], [0, 0, 1, 1], [], []>} : vector<16x32xbf16>, vector<32x64xbf16>, vector<16x64xf32> -> vector<16x64xf32>
    %c0_53 = arith.constant 0 : index
    %c15 = arith.constant 15 : index
    %122 = vector.load %arg1[%c0_53, %c15] : memref<16x48xf32, #tpu.memory_space<vmem>>, vector<16x1xf32>
    %123 = vector.broadcast %122 : vector<16x1xf32> to vector<16x64xf32>
    %124 = vector.broadcast %2 : vector<1x64xf32> to vector<16x64xf32>
    %125 = arith.mulf %123, %124 : vector<16x64xf32>
    %c0_54 = arith.constant 0 : index
    %c16 = arith.constant 16 : index
    %126 = vector.load %arg1[%c0_54, %c16] : memref<16x48xf32, #tpu.memory_space<vmem>>, vector<16x1xf32>
    %127 = vector.broadcast %126 : vector<16x1xf32> to vector<16x64xf32>
    %128 = vector.broadcast %3 : vector<1x64xf32> to vector<16x64xf32>
    %129 = arith.mulf %127, %128 : vector<16x64xf32>
    %130 = arith.addf %125, %129 : vector<16x64xf32>
    %c0_55 = arith.constant 0 : index
    %c17 = arith.constant 17 : index
    %131 = vector.load %arg1[%c0_55, %c17] : memref<16x48xf32, #tpu.memory_space<vmem>>, vector<16x1xf32>
    %132 = vector.broadcast %131 : vector<16x1xf32> to vector<16x64xf32>
    %133 = vector.broadcast %4 : vector<1x64xf32> to vector<16x64xf32>
    %134 = arith.mulf %132, %133 : vector<16x64xf32>
    %135 = arith.addf %130, %134 : vector<16x64xf32>
    %136 = arith.addf %121, %135 : vector<16x64xf32>
    %137 = vector.broadcast %1 : vector<1x64xf32> to vector<16x64xf32>
    %138 = arith.addf %136, %137 : vector<16x64xf32>
    %cst_56 = arith.constant 0.000000e+00 : f32
    %139 = vector.broadcast %cst_56 : f32 to vector<16x64xf32>
    %140 = arith.maximumf %138, %139 : vector<16x64xf32>
    %141 = arith.maximumf %118, %140 : vector<16x64xf32>
    %c6_57 = arith.constant 6 : index
    %c0_58 = arith.constant 0 : index
    %c0_59 = arith.constant 0 : index
    %142 = vector.load %arg2[%c6_57, %c0_58, %c0_59] : memref<16x16x32xbf16, #tpu.memory_space<vmem>>, vector<1x16x32xbf16>
    %143 = vector.shape_cast %142 : vector<1x16x32xbf16> to vector<16x32xbf16>
    %cst_60 = arith.constant dense<0.000000e+00> : vector<16x64xf32>
    %144 = tpu.matmul %143, %0, %cst_60 {dimension_numbers = #tpu.dot_dimension_numbers<[1], [0], [0], [1], [0, 0, 1, 1], [], []>} : vector<16x32xbf16>, vector<32x64xbf16>, vector<16x64xf32> -> vector<16x64xf32>
    %c0_61 = arith.constant 0 : index
    %c18 = arith.constant 18 : index
    %145 = vector.load %arg1[%c0_61, %c18] : memref<16x48xf32, #tpu.memory_space<vmem>>, vector<16x1xf32>
    %146 = vector.broadcast %145 : vector<16x1xf32> to vector<16x64xf32>
    %147 = vector.broadcast %2 : vector<1x64xf32> to vector<16x64xf32>
    %148 = arith.mulf %146, %147 : vector<16x64xf32>
    %c0_62 = arith.constant 0 : index
    %c19 = arith.constant 19 : index
    %149 = vector.load %arg1[%c0_62, %c19] : memref<16x48xf32, #tpu.memory_space<vmem>>, vector<16x1xf32>
    %150 = vector.broadcast %149 : vector<16x1xf32> to vector<16x64xf32>
    %151 = vector.broadcast %3 : vector<1x64xf32> to vector<16x64xf32>
    %152 = arith.mulf %150, %151 : vector<16x64xf32>
    %153 = arith.addf %148, %152 : vector<16x64xf32>
    %c0_63 = arith.constant 0 : index
    %c20 = arith.constant 20 : index
    %154 = vector.load %arg1[%c0_63, %c20] : memref<16x48xf32, #tpu.memory_space<vmem>>, vector<16x1xf32>
    %155 = vector.broadcast %154 : vector<16x1xf32> to vector<16x64xf32>
    %156 = vector.broadcast %4 : vector<1x64xf32> to vector<16x64xf32>
    %157 = arith.mulf %155, %156 : vector<16x64xf32>
    %158 = arith.addf %153, %157 : vector<16x64xf32>
    %159 = arith.addf %144, %158 : vector<16x64xf32>
    %160 = vector.broadcast %1 : vector<1x64xf32> to vector<16x64xf32>
    %161 = arith.addf %159, %160 : vector<16x64xf32>
    %cst_64 = arith.constant 0.000000e+00 : f32
    %162 = vector.broadcast %cst_64 : f32 to vector<16x64xf32>
    %163 = arith.maximumf %161, %162 : vector<16x64xf32>
    %164 = arith.maximumf %141, %163 : vector<16x64xf32>
    %c7_65 = arith.constant 7 : index
    %c0_66 = arith.constant 0 : index
    %c0_67 = arith.constant 0 : index
    %165 = vector.load %arg2[%c7_65, %c0_66, %c0_67] : memref<16x16x32xbf16, #tpu.memory_space<vmem>>, vector<1x16x32xbf16>
    %166 = vector.shape_cast %165 : vector<1x16x32xbf16> to vector<16x32xbf16>
    %cst_68 = arith.constant dense<0.000000e+00> : vector<16x64xf32>
    %167 = tpu.matmul %166, %0, %cst_68 {dimension_numbers = #tpu.dot_dimension_numbers<[1], [0], [0], [1], [0, 0, 1, 1], [], []>} : vector<16x32xbf16>, vector<32x64xbf16>, vector<16x64xf32> -> vector<16x64xf32>
    %c0_69 = arith.constant 0 : index
    %c21 = arith.constant 21 : index
    %168 = vector.load %arg1[%c0_69, %c21] : memref<16x48xf32, #tpu.memory_space<vmem>>, vector<16x1xf32>
    %169 = vector.broadcast %168 : vector<16x1xf32> to vector<16x64xf32>
    %170 = vector.broadcast %2 : vector<1x64xf32> to vector<16x64xf32>
    %171 = arith.mulf %169, %170 : vector<16x64xf32>
    %c0_70 = arith.constant 0 : index
    %c22 = arith.constant 22 : index
    %172 = vector.load %arg1[%c0_70, %c22] : memref<16x48xf32, #tpu.memory_space<vmem>>, vector<16x1xf32>
    %173 = vector.broadcast %172 : vector<16x1xf32> to vector<16x64xf32>
    %174 = vector.broadcast %3 : vector<1x64xf32> to vector<16x64xf32>
    %175 = arith.mulf %173, %174 : vector<16x64xf32>
    %176 = arith.addf %171, %175 : vector<16x64xf32>
    %c0_71 = arith.constant 0 : index
    %c23 = arith.constant 23 : index
    %177 = vector.load %arg1[%c0_71, %c23] : memref<16x48xf32, #tpu.memory_space<vmem>>, vector<16x1xf32>
    %178 = vector.broadcast %177 : vector<16x1xf32> to vector<16x64xf32>
    %179 = vector.broadcast %4 : vector<1x64xf32> to vector<16x64xf32>
    %180 = arith.mulf %178, %179 : vector<16x64xf32>
    %181 = arith.addf %176, %180 : vector<16x64xf32>
    %182 = arith.addf %167, %181 : vector<16x64xf32>
    %183 = vector.broadcast %1 : vector<1x64xf32> to vector<16x64xf32>
    %184 = arith.addf %182, %183 : vector<16x64xf32>
    %cst_72 = arith.constant 0.000000e+00 : f32
    %185 = vector.broadcast %cst_72 : f32 to vector<16x64xf32>
    %186 = arith.maximumf %184, %185 : vector<16x64xf32>
    %187 = arith.maximumf %164, %186 : vector<16x64xf32>
    %c8_73 = arith.constant 8 : index
    %c0_74 = arith.constant 0 : index
    %c0_75 = arith.constant 0 : index
    %188 = vector.load %arg2[%c8_73, %c0_74, %c0_75] : memref<16x16x32xbf16, #tpu.memory_space<vmem>>, vector<1x16x32xbf16>
    %189 = vector.shape_cast %188 : vector<1x16x32xbf16> to vector<16x32xbf16>
    %cst_76 = arith.constant dense<0.000000e+00> : vector<16x64xf32>
    %190 = tpu.matmul %189, %0, %cst_76 {dimension_numbers = #tpu.dot_dimension_numbers<[1], [0], [0], [1], [0, 0, 1, 1], [], []>} : vector<16x32xbf16>, vector<32x64xbf16>, vector<16x64xf32> -> vector<16x64xf32>
    %c0_77 = arith.constant 0 : index
    %c24 = arith.constant 24 : index
    %191 = vector.load %arg1[%c0_77, %c24] : memref<16x48xf32, #tpu.memory_space<vmem>>, vector<16x1xf32>
    %192 = vector.broadcast %191 : vector<16x1xf32> to vector<16x64xf32>
    %193 = vector.broadcast %2 : vector<1x64xf32> to vector<16x64xf32>
    %194 = arith.mulf %192, %193 : vector<16x64xf32>
    %c0_78 = arith.constant 0 : index
    %c25 = arith.constant 25 : index
    %195 = vector.load %arg1[%c0_78, %c25] : memref<16x48xf32, #tpu.memory_space<vmem>>, vector<16x1xf32>
    %196 = vector.broadcast %195 : vector<16x1xf32> to vector<16x64xf32>
    %197 = vector.broadcast %3 : vector<1x64xf32> to vector<16x64xf32>
    %198 = arith.mulf %196, %197 : vector<16x64xf32>
    %199 = arith.addf %194, %198 : vector<16x64xf32>
    %c0_79 = arith.constant 0 : index
    %c26 = arith.constant 26 : index
    %200 = vector.load %arg1[%c0_79, %c26] : memref<16x48xf32, #tpu.memory_space<vmem>>, vector<16x1xf32>
    %201 = vector.broadcast %200 : vector<16x1xf32> to vector<16x64xf32>
    %202 = vector.broadcast %4 : vector<1x64xf32> to vector<16x64xf32>
    %203 = arith.mulf %201, %202 : vector<16x64xf32>
    %204 = arith.addf %199, %203 : vector<16x64xf32>
    %205 = arith.addf %190, %204 : vector<16x64xf32>
    %206 = vector.broadcast %1 : vector<1x64xf32> to vector<16x64xf32>
    %207 = arith.addf %205, %206 : vector<16x64xf32>
    %cst_80 = arith.constant 0.000000e+00 : f32
    %208 = vector.broadcast %cst_80 : f32 to vector<16x64xf32>
    %209 = arith.maximumf %207, %208 : vector<16x64xf32>
    %210 = arith.maximumf %187, %209 : vector<16x64xf32>
    %c9_81 = arith.constant 9 : index
    %c0_82 = arith.constant 0 : index
    %c0_83 = arith.constant 0 : index
    %211 = vector.load %arg2[%c9_81, %c0_82, %c0_83] : memref<16x16x32xbf16, #tpu.memory_space<vmem>>, vector<1x16x32xbf16>
    %212 = vector.shape_cast %211 : vector<1x16x32xbf16> to vector<16x32xbf16>
    %cst_84 = arith.constant dense<0.000000e+00> : vector<16x64xf32>
    %213 = tpu.matmul %212, %0, %cst_84 {dimension_numbers = #tpu.dot_dimension_numbers<[1], [0], [0], [1], [0, 0, 1, 1], [], []>} : vector<16x32xbf16>, vector<32x64xbf16>, vector<16x64xf32> -> vector<16x64xf32>
    %c0_85 = arith.constant 0 : index
    %c27 = arith.constant 27 : index
    %214 = vector.load %arg1[%c0_85, %c27] : memref<16x48xf32, #tpu.memory_space<vmem>>, vector<16x1xf32>
    %215 = vector.broadcast %214 : vector<16x1xf32> to vector<16x64xf32>
    %216 = vector.broadcast %2 : vector<1x64xf32> to vector<16x64xf32>
    %217 = arith.mulf %215, %216 : vector<16x64xf32>
    %c0_86 = arith.constant 0 : index
    %c28 = arith.constant 28 : index
    %218 = vector.load %arg1[%c0_86, %c28] : memref<16x48xf32, #tpu.memory_space<vmem>>, vector<16x1xf32>
    %219 = vector.broadcast %218 : vector<16x1xf32> to vector<16x64xf32>
    %220 = vector.broadcast %3 : vector<1x64xf32> to vector<16x64xf32>
    %221 = arith.mulf %219, %220 : vector<16x64xf32>
    %222 = arith.addf %217, %221 : vector<16x64xf32>
    %c0_87 = arith.constant 0 : index
    %c29 = arith.constant 29 : index
    %223 = vector.load %arg1[%c0_87, %c29] : memref<16x48xf32, #tpu.memory_space<vmem>>, vector<16x1xf32>
    %224 = vector.broadcast %223 : vector<16x1xf32> to vector<16x64xf32>
    %225 = vector.broadcast %4 : vector<1x64xf32> to vector<16x64xf32>
    %226 = arith.mulf %224, %225 : vector<16x64xf32>
    %227 = arith.addf %222, %226 : vector<16x64xf32>
    %228 = arith.addf %213, %227 : vector<16x64xf32>
    %229 = vector.broadcast %1 : vector<1x64xf32> to vector<16x64xf32>
    %230 = arith.addf %228, %229 : vector<16x64xf32>
    %cst_88 = arith.constant 0.000000e+00 : f32
    %231 = vector.broadcast %cst_88 : f32 to vector<16x64xf32>
    %232 = arith.maximumf %230, %231 : vector<16x64xf32>
    %233 = arith.maximumf %210, %232 : vector<16x64xf32>
    %c10_89 = arith.constant 10 : index
    %c0_90 = arith.constant 0 : index
    %c0_91 = arith.constant 0 : index
    %234 = vector.load %arg2[%c10_89, %c0_90, %c0_91] : memref<16x16x32xbf16, #tpu.memory_space<vmem>>, vector<1x16x32xbf16>
    %235 = vector.shape_cast %234 : vector<1x16x32xbf16> to vector<16x32xbf16>
    %cst_92 = arith.constant dense<0.000000e+00> : vector<16x64xf32>
    %236 = tpu.matmul %235, %0, %cst_92 {dimension_numbers = #tpu.dot_dimension_numbers<[1], [0], [0], [1], [0, 0, 1, 1], [], []>} : vector<16x32xbf16>, vector<32x64xbf16>, vector<16x64xf32> -> vector<16x64xf32>
    %c0_93 = arith.constant 0 : index
    %c30 = arith.constant 30 : index
    %237 = vector.load %arg1[%c0_93, %c30] : memref<16x48xf32, #tpu.memory_space<vmem>>, vector<16x1xf32>
    %238 = vector.broadcast %237 : vector<16x1xf32> to vector<16x64xf32>
    %239 = vector.broadcast %2 : vector<1x64xf32> to vector<16x64xf32>
    %240 = arith.mulf %238, %239 : vector<16x64xf32>
    %c0_94 = arith.constant 0 : index
    %c31 = arith.constant 31 : index
    %241 = vector.load %arg1[%c0_94, %c31] : memref<16x48xf32, #tpu.memory_space<vmem>>, vector<16x1xf32>
    %242 = vector.broadcast %241 : vector<16x1xf32> to vector<16x64xf32>
    %243 = vector.broadcast %3 : vector<1x64xf32> to vector<16x64xf32>
    %244 = arith.mulf %242, %243 : vector<16x64xf32>
    %245 = arith.addf %240, %244 : vector<16x64xf32>
    %c0_95 = arith.constant 0 : index
    %c32 = arith.constant 32 : index
    %246 = vector.load %arg1[%c0_95, %c32] : memref<16x48xf32, #tpu.memory_space<vmem>>, vector<16x1xf32>
    %247 = vector.broadcast %246 : vector<16x1xf32> to vector<16x64xf32>
    %248 = vector.broadcast %4 : vector<1x64xf32> to vector<16x64xf32>
    %249 = arith.mulf %247, %248 : vector<16x64xf32>
    %250 = arith.addf %245, %249 : vector<16x64xf32>
    %251 = arith.addf %236, %250 : vector<16x64xf32>
    %252 = vector.broadcast %1 : vector<1x64xf32> to vector<16x64xf32>
    %253 = arith.addf %251, %252 : vector<16x64xf32>
    %cst_96 = arith.constant 0.000000e+00 : f32
    %254 = vector.broadcast %cst_96 : f32 to vector<16x64xf32>
    %255 = arith.maximumf %253, %254 : vector<16x64xf32>
    %256 = arith.maximumf %233, %255 : vector<16x64xf32>
    %c11_97 = arith.constant 11 : index
    %c0_98 = arith.constant 0 : index
    %c0_99 = arith.constant 0 : index
    %257 = vector.load %arg2[%c11_97, %c0_98, %c0_99] : memref<16x16x32xbf16, #tpu.memory_space<vmem>>, vector<1x16x32xbf16>
    %258 = vector.shape_cast %257 : vector<1x16x32xbf16> to vector<16x32xbf16>
    %cst_100 = arith.constant dense<0.000000e+00> : vector<16x64xf32>
    %259 = tpu.matmul %258, %0, %cst_100 {dimension_numbers = #tpu.dot_dimension_numbers<[1], [0], [0], [1], [0, 0, 1, 1], [], []>} : vector<16x32xbf16>, vector<32x64xbf16>, vector<16x64xf32> -> vector<16x64xf32>
    %c0_101 = arith.constant 0 : index
    %c33 = arith.constant 33 : index
    %260 = vector.load %arg1[%c0_101, %c33] : memref<16x48xf32, #tpu.memory_space<vmem>>, vector<16x1xf32>
    %261 = vector.broadcast %260 : vector<16x1xf32> to vector<16x64xf32>
    %262 = vector.broadcast %2 : vector<1x64xf32> to vector<16x64xf32>
    %263 = arith.mulf %261, %262 : vector<16x64xf32>
    %c0_102 = arith.constant 0 : index
    %c34 = arith.constant 34 : index
    %264 = vector.load %arg1[%c0_102, %c34] : memref<16x48xf32, #tpu.memory_space<vmem>>, vector<16x1xf32>
    %265 = vector.broadcast %264 : vector<16x1xf32> to vector<16x64xf32>
    %266 = vector.broadcast %3 : vector<1x64xf32> to vector<16x64xf32>
    %267 = arith.mulf %265, %266 : vector<16x64xf32>
    %268 = arith.addf %263, %267 : vector<16x64xf32>
    %c0_103 = arith.constant 0 : index
    %c35 = arith.constant 35 : index
    %269 = vector.load %arg1[%c0_103, %c35] : memref<16x48xf32, #tpu.memory_space<vmem>>, vector<16x1xf32>
    %270 = vector.broadcast %269 : vector<16x1xf32> to vector<16x64xf32>
    %271 = vector.broadcast %4 : vector<1x64xf32> to vector<16x64xf32>
    %272 = arith.mulf %270, %271 : vector<16x64xf32>
    %273 = arith.addf %268, %272 : vector<16x64xf32>
    %274 = arith.addf %259, %273 : vector<16x64xf32>
    %275 = vector.broadcast %1 : vector<1x64xf32> to vector<16x64xf32>
    %276 = arith.addf %274, %275 : vector<16x64xf32>
    %cst_104 = arith.constant 0.000000e+00 : f32
    %277 = vector.broadcast %cst_104 : f32 to vector<16x64xf32>
    %278 = arith.maximumf %276, %277 : vector<16x64xf32>
    %279 = arith.maximumf %256, %278 : vector<16x64xf32>
    %c12_105 = arith.constant 12 : index
    %c0_106 = arith.constant 0 : index
    %c0_107 = arith.constant 0 : index
    %280 = vector.load %arg2[%c12_105, %c0_106, %c0_107] : memref<16x16x32xbf16, #tpu.memory_space<vmem>>, vector<1x16x32xbf16>
    %281 = vector.shape_cast %280 : vector<1x16x32xbf16> to vector<16x32xbf16>
    %cst_108 = arith.constant dense<0.000000e+00> : vector<16x64xf32>
    %282 = tpu.matmul %281, %0, %cst_108 {dimension_numbers = #tpu.dot_dimension_numbers<[1], [0], [0], [1], [0, 0, 1, 1], [], []>} : vector<16x32xbf16>, vector<32x64xbf16>, vector<16x64xf32> -> vector<16x64xf32>
    %c0_109 = arith.constant 0 : index
    %c36 = arith.constant 36 : index
    %283 = vector.load %arg1[%c0_109, %c36] : memref<16x48xf32, #tpu.memory_space<vmem>>, vector<16x1xf32>
    %284 = vector.broadcast %283 : vector<16x1xf32> to vector<16x64xf32>
    %285 = vector.broadcast %2 : vector<1x64xf32> to vector<16x64xf32>
    %286 = arith.mulf %284, %285 : vector<16x64xf32>
    %c0_110 = arith.constant 0 : index
    %c37 = arith.constant 37 : index
    %287 = vector.load %arg1[%c0_110, %c37] : memref<16x48xf32, #tpu.memory_space<vmem>>, vector<16x1xf32>
    %288 = vector.broadcast %287 : vector<16x1xf32> to vector<16x64xf32>
    %289 = vector.broadcast %3 : vector<1x64xf32> to vector<16x64xf32>
    %290 = arith.mulf %288, %289 : vector<16x64xf32>
    %291 = arith.addf %286, %290 : vector<16x64xf32>
    %c0_111 = arith.constant 0 : index
    %c38 = arith.constant 38 : index
    %292 = vector.load %arg1[%c0_111, %c38] : memref<16x48xf32, #tpu.memory_space<vmem>>, vector<16x1xf32>
    %293 = vector.broadcast %292 : vector<16x1xf32> to vector<16x64xf32>
    %294 = vector.broadcast %4 : vector<1x64xf32> to vector<16x64xf32>
    %295 = arith.mulf %293, %294 : vector<16x64xf32>
    %296 = arith.addf %291, %295 : vector<16x64xf32>
    %297 = arith.addf %282, %296 : vector<16x64xf32>
    %298 = vector.broadcast %1 : vector<1x64xf32> to vector<16x64xf32>
    %299 = arith.addf %297, %298 : vector<16x64xf32>
    %cst_112 = arith.constant 0.000000e+00 : f32
    %300 = vector.broadcast %cst_112 : f32 to vector<16x64xf32>
    %301 = arith.maximumf %299, %300 : vector<16x64xf32>
    %302 = arith.maximumf %279, %301 : vector<16x64xf32>
    %c13_113 = arith.constant 13 : index
    %c0_114 = arith.constant 0 : index
    %c0_115 = arith.constant 0 : index
    %303 = vector.load %arg2[%c13_113, %c0_114, %c0_115] : memref<16x16x32xbf16, #tpu.memory_space<vmem>>, vector<1x16x32xbf16>
    %304 = vector.shape_cast %303 : vector<1x16x32xbf16> to vector<16x32xbf16>
    %cst_116 = arith.constant dense<0.000000e+00> : vector<16x64xf32>
    %305 = tpu.matmul %304, %0, %cst_116 {dimension_numbers = #tpu.dot_dimension_numbers<[1], [0], [0], [1], [0, 0, 1, 1], [], []>} : vector<16x32xbf16>, vector<32x64xbf16>, vector<16x64xf32> -> vector<16x64xf32>
    %c0_117 = arith.constant 0 : index
    %c39 = arith.constant 39 : index
    %306 = vector.load %arg1[%c0_117, %c39] : memref<16x48xf32, #tpu.memory_space<vmem>>, vector<16x1xf32>
    %307 = vector.broadcast %306 : vector<16x1xf32> to vector<16x64xf32>
    %308 = vector.broadcast %2 : vector<1x64xf32> to vector<16x64xf32>
    %309 = arith.mulf %307, %308 : vector<16x64xf32>
    %c0_118 = arith.constant 0 : index
    %c40 = arith.constant 40 : index
    %310 = vector.load %arg1[%c0_118, %c40] : memref<16x48xf32, #tpu.memory_space<vmem>>, vector<16x1xf32>
    %311 = vector.broadcast %310 : vector<16x1xf32> to vector<16x64xf32>
    %312 = vector.broadcast %3 : vector<1x64xf32> to vector<16x64xf32>
    %313 = arith.mulf %311, %312 : vector<16x64xf32>
    %314 = arith.addf %309, %313 : vector<16x64xf32>
    %c0_119 = arith.constant 0 : index
    %c41 = arith.constant 41 : index
    %315 = vector.load %arg1[%c0_119, %c41] : memref<16x48xf32, #tpu.memory_space<vmem>>, vector<16x1xf32>
    %316 = vector.broadcast %315 : vector<16x1xf32> to vector<16x64xf32>
    %317 = vector.broadcast %4 : vector<1x64xf32> to vector<16x64xf32>
    %318 = arith.mulf %316, %317 : vector<16x64xf32>
    %319 = arith.addf %314, %318 : vector<16x64xf32>
    %320 = arith.addf %305, %319 : vector<16x64xf32>
    %321 = vector.broadcast %1 : vector<1x64xf32> to vector<16x64xf32>
    %322 = arith.addf %320, %321 : vector<16x64xf32>
    %cst_120 = arith.constant 0.000000e+00 : f32
    %323 = vector.broadcast %cst_120 : f32 to vector<16x64xf32>
    %324 = arith.maximumf %322, %323 : vector<16x64xf32>
    %325 = arith.maximumf %302, %324 : vector<16x64xf32>
    %c14_121 = arith.constant 14 : index
    %c0_122 = arith.constant 0 : index
    %c0_123 = arith.constant 0 : index
    %326 = vector.load %arg2[%c14_121, %c0_122, %c0_123] : memref<16x16x32xbf16, #tpu.memory_space<vmem>>, vector<1x16x32xbf16>
    %327 = vector.shape_cast %326 : vector<1x16x32xbf16> to vector<16x32xbf16>
    %cst_124 = arith.constant dense<0.000000e+00> : vector<16x64xf32>
    %328 = tpu.matmul %327, %0, %cst_124 {dimension_numbers = #tpu.dot_dimension_numbers<[1], [0], [0], [1], [0, 0, 1, 1], [], []>} : vector<16x32xbf16>, vector<32x64xbf16>, vector<16x64xf32> -> vector<16x64xf32>
    %c0_125 = arith.constant 0 : index
    %c42 = arith.constant 42 : index
    %329 = vector.load %arg1[%c0_125, %c42] : memref<16x48xf32, #tpu.memory_space<vmem>>, vector<16x1xf32>
    %330 = vector.broadcast %329 : vector<16x1xf32> to vector<16x64xf32>
    %331 = vector.broadcast %2 : vector<1x64xf32> to vector<16x64xf32>
    %332 = arith.mulf %330, %331 : vector<16x64xf32>
    %c0_126 = arith.constant 0 : index
    %c43 = arith.constant 43 : index
    %333 = vector.load %arg1[%c0_126, %c43] : memref<16x48xf32, #tpu.memory_space<vmem>>, vector<16x1xf32>
    %334 = vector.broadcast %333 : vector<16x1xf32> to vector<16x64xf32>
    %335 = vector.broadcast %3 : vector<1x64xf32> to vector<16x64xf32>
    %336 = arith.mulf %334, %335 : vector<16x64xf32>
    %337 = arith.addf %332, %336 : vector<16x64xf32>
    %c0_127 = arith.constant 0 : index
    %c44 = arith.constant 44 : index
    %338 = vector.load %arg1[%c0_127, %c44] : memref<16x48xf32, #tpu.memory_space<vmem>>, vector<16x1xf32>
    %339 = vector.broadcast %338 : vector<16x1xf32> to vector<16x64xf32>
    %340 = vector.broadcast %4 : vector<1x64xf32> to vector<16x64xf32>
    %341 = arith.mulf %339, %340 : vector<16x64xf32>
    %342 = arith.addf %337, %341 : vector<16x64xf32>
    %343 = arith.addf %328, %342 : vector<16x64xf32>
    %344 = vector.broadcast %1 : vector<1x64xf32> to vector<16x64xf32>
    %345 = arith.addf %343, %344 : vector<16x64xf32>
    %cst_128 = arith.constant 0.000000e+00 : f32
    %346 = vector.broadcast %cst_128 : f32 to vector<16x64xf32>
    %347 = arith.maximumf %345, %346 : vector<16x64xf32>
    %348 = arith.maximumf %325, %347 : vector<16x64xf32>
    %c15_129 = arith.constant 15 : index
    %c0_130 = arith.constant 0 : index
    %c0_131 = arith.constant 0 : index
    %349 = vector.load %arg2[%c15_129, %c0_130, %c0_131] : memref<16x16x32xbf16, #tpu.memory_space<vmem>>, vector<1x16x32xbf16>
    %350 = vector.shape_cast %349 : vector<1x16x32xbf16> to vector<16x32xbf16>
    %cst_132 = arith.constant dense<0.000000e+00> : vector<16x64xf32>
    %351 = tpu.matmul %350, %0, %cst_132 {dimension_numbers = #tpu.dot_dimension_numbers<[1], [0], [0], [1], [0, 0, 1, 1], [], []>} : vector<16x32xbf16>, vector<32x64xbf16>, vector<16x64xf32> -> vector<16x64xf32>
    %c0_133 = arith.constant 0 : index
    %c45 = arith.constant 45 : index
    %352 = vector.load %arg1[%c0_133, %c45] : memref<16x48xf32, #tpu.memory_space<vmem>>, vector<16x1xf32>
    %353 = vector.broadcast %352 : vector<16x1xf32> to vector<16x64xf32>
    %354 = vector.broadcast %2 : vector<1x64xf32> to vector<16x64xf32>
    %355 = arith.mulf %353, %354 : vector<16x64xf32>
    %c0_134 = arith.constant 0 : index
    %c46 = arith.constant 46 : index
    %356 = vector.load %arg1[%c0_134, %c46] : memref<16x48xf32, #tpu.memory_space<vmem>>, vector<16x1xf32>
    %357 = vector.broadcast %356 : vector<16x1xf32> to vector<16x64xf32>
    %358 = vector.broadcast %3 : vector<1x64xf32> to vector<16x64xf32>
    %359 = arith.mulf %357, %358 : vector<16x64xf32>
    %360 = arith.addf %355, %359 : vector<16x64xf32>
    %c0_135 = arith.constant 0 : index
    %c47 = arith.constant 47 : index
    %361 = vector.load %arg1[%c0_135, %c47] : memref<16x48xf32, #tpu.memory_space<vmem>>, vector<16x1xf32>
    %362 = vector.broadcast %361 : vector<16x1xf32> to vector<16x64xf32>
    %363 = vector.broadcast %4 : vector<1x64xf32> to vector<16x64xf32>
    %364 = arith.mulf %362, %363 : vector<16x64xf32>
    %365 = arith.addf %360, %364 : vector<16x64xf32>
    %366 = arith.addf %351, %365 : vector<16x64xf32>
    %367 = vector.broadcast %1 : vector<1x64xf32> to vector<16x64xf32>
    %368 = arith.addf %366, %367 : vector<16x64xf32>
    %cst_136 = arith.constant 0.000000e+00 : f32
    %369 = vector.broadcast %cst_136 : f32 to vector<16x64xf32>
    %370 = arith.maximumf %368, %369 : vector<16x64xf32>
    %371 = arith.maximumf %348, %370 : vector<16x64xf32>
    %c0_137 = arith.constant 0 : index
    %c0_138 = arith.constant 0 : index
    %372 = vector.load %arg6[%c0_137, %c0_138] : memref<16x64xf32, #tpu.memory_space<vmem>>, vector<16x64xf32>
    tpu.vector_store %arg6[%c0_137, %c0_138], %371 {strides = array<i32>} : memref<16x64xf32, #tpu.memory_space<vmem>>, vector<16x64xf32>,
    return
  }
  func.func @transform_0(%arg0: i32) -> (i32, i32) {
    %c0_i32 = arith.constant 0 : i32
    %c0_i32_0 = arith.constant 0 : i32
    return %arg0, %c0_i32 : i32, i32
  }
  func.func @transform_1(%arg0: i32) -> (i32, i32, i32) {
    %c0_i32 = arith.constant 0 : i32
    %c0_i32_0 = arith.constant 0 : i32
    %c0_i32_1 = arith.constant 0 : i32
    return %c0_i32, %arg0, %c0_i32_0 : i32, i32, i32
  }
  func.func @transform_2(%arg0: i32) -> (i32, i32) {
    %c0_i32 = arith.constant 0 : i32
    %c0_i32_0 = arith.constant 0 : i32
    %c0_i32_1 = arith.constant 0 : i32
    return %c0_i32, %c0_i32_0 : i32, i32
  }
  func.func @transform_3(%arg0: i32) -> (i32, i32) {
    %c0_i32 = arith.constant 0 : i32
    %c0_i32_0 = arith.constant 0 : i32
    %c0_i32_1 = arith.constant 0 : i32
    return %c0_i32, %c0_i32_0 : i32, i32
  }
  func.func @transform_4(%arg0: i32) -> (i32, i32) {
    %c0_i32 = arith.constant 0 : i32
    %c0_i32_0 = arith.constant 0 : i32
    %c0_i32_1 = arith.constant 0 : i32
    return %c0_i32, %c0_i32_0 : i32, i32
  }
  func.func @transform_5(%arg0: i32) -> (i32, i32) {
    %c0_i32 = arith.constant 0 : i32
    %c0_i32_0 = arith.constant 0 : i32
    return %arg0, %c0_i32 : i32, i32
  }
}

</mosaic_0001>

<bundles_post_ra>
// kernel: tpu_custom_call.1
= control target key start
LH: loop header
LB: loop body
LE: loop exit
PB: predicated region body
PF: predicated region fallthrough
CT: control target
= control target key end

     0   :  { %s2746_s0 = inlined_call_operand.hbm [shape: f32[32,48], index: 0, kind: input, shape index: {}]   ;;  %s2747_s1 = inlined_call_operand.hbm [shape: bf16[16,32,32], index: 1, kind: input, shape index: {}]   ;;  %s2748_s2 = inlined_call_operand.hbm [shape: bf16[32,64], index: 2, kind: input, shape index: {}]   ;;  %s2749_s3 = inlined_call_operand.hbm [shape: f32[3,64], index: 3, kind: input, shape index: {}]   ;;  %s2750_s4 = inlined_call_operand.vmem [shape: f32[1,64], index: 4, kind: input, shape index: {}]   ;;  %s2751_s5 = inlined_call_operand.hbm [shape: f32[32,64], index: 5, kind: output, shape index: {}]  }
   0x1   :  { %2752 = sst [smem:[#allocation20_spill]] %s2748_s2 }
   0x2   :  { %2753 = sst [smem:[#allocation21_spill]] %s2749_s3 }
   0x3   :  { %10 = vsyncpa [#allocation3], 0 }
   0x4   :  { %12 = vsyncpa [#allocation3 + $0x1], 0 }
   0x5   :  { %13 = vsyncpa [#allocation6], 0 }
   0x6   :  { %15 = vsyncpa [#allocation6 + $0x1], 0 }
   0x7   :  { %16 = vsyncpa [#allocation9], 0 }
   0x8   :  { %17 = vsyncpa [#allocation4], 0 }
   0x9   :  { %19 = vsyncpa [#allocation4 + $0x1], 0  ;;  %s2207_s18 = smov 0   ;;  %s2209_s19 = smov 0  }
   0xa   :  { %s2211_s20 = smov 0   ;;  %s2213_s21 = smov 0  }
   0xb LB: > { %s2228_s22 = sadd.s32 4294967295, %s2113_s21   ;;  %s1549_s23 = sadd.s32 4294967294, %s2113_s21   ;;  %s2113_s21 = sphi %s2213_s21, %s2766_s21   ;;  %s2109_s20 = sphi %s2211_s20, %s2765_s20   ;;  %s2105_s19 = sphi %s2209_s19, %s2764_s19   ;;  %s2101_s18 = sphi %s2207_s18, %s2763_s18  }
   0xc   : > { %s2232_s24 = sadd.s32 1, %s2113_s21   ;;  %s32_s25 = sadd.s32 1, %s2109_s20 }
   0xd   : > { %s29_s26 = ssub.s32 %s2113_s21, %s2232_s24  ;;  %p39_p0 = scmp.ne.s32.totalorder %s2109_s20, %s2105_s19 }
   0xe   : > { %p30_p1 = scmp.eq.s32.totalorder %s29_s26, 0  ;;  %p40_p2 = scmp.eq.s32.totalorder %s2113_s21, 0 }
   0xf   : > { %p45_p3 = scmp.ne.s32.totalorder %s2105_s19, %s2101_s18  ;;  %p46_p4 = scmp.eq.s32.totalorder %s2228_s22, 0 }
  0x10   : > { %s2244_s27 = scalar_select %p30_p1, %s2109_s20, %s32_s25  }
  0x11   : > { %p2246_p5 = por %p40_p2, %p39_p0  ;;  %p2252_p6 = por %p46_p4, %p45_p3 }
  0x12   : > { %2754 = sst [smem:[#allocation19_spill]] %s2244_s27  ;;  %p158_p7 = scmp.eq.s32.totalorder %s2228_s22, 1 }
  0x13   : > { %p164_p8 = scmp.eq.s32.totalorder %s1549_s23, 1  ;;  %p1550_p9 = scmp.ge.s32.totalorder %s2113_s21, 1 }
  0x14   : > { %p171_p10 = scmp.lt.s32.totalorder %s2113_s21, 3  ;;  %p2259_p11 = por %p158_p7, %p39_p0 }
  0x15   : > { %p2263_p12 = por %p164_p8, %p45_p3  ;;  %s2760_s2 = sld [smem:[#allocation20_spill]] }
  0x16   : > { %p2267_p13 = pnand %p1550_p9, %p171_p10  ;;  %s2115_s11 = smov [#allocation7]  }
  0x17   : > { %s184_s12 = sshll.u32 %s2115_s11, 4  ;;  %s2761_s3 = sld [smem:[#allocation21_spill]]  ;;  %s185_s12 = int_to_ptr.vmem [resolvable:$true] %s184_s12 }
  0x18   : > { %p1733_p1 = pneg %p2267_p13  ;;  %s2116_s16 = smov 64  }
  0x19   : > { %s2117_s17 = smov 4   ;;  %s2118_s23 = smov [#allocation8]  }
  0x1a   : > { %p1734_p0 = pnand %p1733_p1, %p46_p4  ;;  %s199_s25 = sshll.u32 %s2118_s23, 4  ;;  %s200_s25 = int_to_ptr.vmem [resolvable:$true] %s199_s25 }
  0x1b   : > { %s182_s10 = sshll.u32 %s2760_s2, 4  ;;  %p1553_p2 = scmp.ge.s32.totalorder %s2113_s21, 2  ;;  %s183_s10 = int_to_ptr.hbm [resolvable:$true] %s182_s10 }
  0x1c   : > { %1736 = dma.hbm_to_vmem [thread:$0]  (!%p1734_p0), %s183_s10, 256, %s185_s12, [#allocation6], %s2116_s16, %s2116_s16, %s2117_s17  }
  0x1d   : > { %s197_s15 = sshll.u32 %s2761_s3, 4  ;;  %209 = sbr.rel (%p1553_p2) target bundleno = 62 (0x3e), region = 28  ;;  %s198_s15 = int_to_ptr.hbm [resolvable:$true] %s197_s15 }
  0x1e   : > { %1739 = dma.hbm_to_vmem [thread:$0]  (!%p1734_p0), %s198_s15, 64, %s200_s25, [#allocation9]  }
  0x1f   : > { %s2285_s26 = sand.u32 (!%p1553_p2), 1, %s2109_s20   ;;  %s1691_s8 = sshll.u32 (!%p1553_p2), %s2113_s21, 4 }
  0x20   : > { %s1554_s9 = sshll.u32 (!%p1553_p2), %s2285_s26, 4  ;;  %s222_s12 = scalar_lea.hbm (!%p1553_p2), %s2746_s0, %s1691_s8 }
  0x21   : > { %s223_s13 = sshll.u32 (!%p1553_p2), %s222_s12, 4  ;;  %s217_s14 = scalar_lea.vmem (!%p1553_p2), [#allocation2], %s1554_s9  ;;  %s224_s13 = int_to_ptr.hbm [resolvable:$true] %s223_s13 }
  0x22   : > { %s225_s15 = sshll.u32 %s217_s14, 4  ;;  %s214_s16 = scalar_lea.sflag [#allocation3], %s2285_s26  ;;  %s226_s15 = int_to_ptr.vmem [resolvable:$true] %s225_s15 }
  0x23   : > { %s2007_s17 = sshra.s32 %s224_s13, 4  ;;  %s2013_s3 = scalar_lea.hbm %s2746_s0, 32  ;;  %s2008_s17 = int_to_ptr.hbm [resolvable:$true] %s2007_s17 }
  0x24   : > { %s2009_s23 = scalar_lea.hbm %s2008_s17, 16  ;;  %p2014_p9 = scmp.lt.s32.totalorder %s2008_s17, %s2746_s0 }
  0x25   : > { %p2010_p3 = scmp.ne.s32.totalorder %s2008_s17, %s2009_s23  ;;  %p2015_p10 = scmp.lt.s32.totalorder %s2013_s3, %s2009_s23 }
  0x27   : > { %p2011_p7 = pnand %p2010_p3, %p2246_p5  ;;  %p2016_p1 = por %p2015_p10, %p2014_p9 }
  0x29   : > { %p2012_p8 = pneg %p2011_p7 }
  0x2b   : > { %p2017_p0 = pnand %p2016_p1, %p2012_p8 }
  0x2d   : > { %2020 = shalt.err (!%p2017_p0)
}
  0x2e   : > { %s2119_s8 = smov 128   ;;  %s2120_s9 = smov 8  }
  0x2f   : > { %1716 = dma.hbm_to_vmem [thread:$0]  (%p2246_p5), %s224_s13, 256, %s226_s15, %s214_s16, %s2119_s8, %s2119_s8, %s2120_s9  }
  0x30   : > { %s235_s2 = sand.u32 1, %s2113_s21   ;;  %s1557_s11 = sshll.u32 %s2285_s26, 7 }
  0x31   : > { %s1692_s27 = sshll.u32 %s2113_s21, 3  ;;  %s239_s3 = scalar_lea.vmem [#allocation5], %s1557_s11 }
  0x32   : > { %s259_s12 = sshll.u32 %s239_s3, 4  ;;  %s244_s23 = scalar_lea.hbm %s2747_s1, %s1692_s27  ;;  %s260_s12 = int_to_ptr.vmem [resolvable:$true] %s259_s12 }
  0x33   : > { %s1717_s13 = scalar_select %p2246_p5, [#allocation0], [#allocation13] }
  0x34   : > { %s257_s15 = sshll.u32 %s244_s23, 4  ;;  %s2121_s25 = smov 256   ;;  %s258_s15 = int_to_ptr.hbm [resolvable:$true] %s257_s15 }
  0x35   : > { %s249_s16 = sld [smem:[%s1717_s13]]   ;;  %s2122_s26 = smov 128  }
  0x36   : > { %1718 = sst [smem:[#allocation12]] (%p2246_p5), %s2121_s25  ;;  %s2123_s10 = smov 2  }
  0x37   : > { %1719 = sst [smem:[#allocation12 + $0x1]] (%p2246_p5), %s2122_s26  ;;  %s2124_s8 = smov 64  }
  0x38   : > { %1720 = sst [smem:[#allocation12 + $0x2]] (%p2246_p5), %s2123_s10  ;;  %s2125_s11 = smov 4  }
  0x39   : > { %1721 = sst [smem:[#allocation12 + $0x3]] (%p2246_p5), %s2124_s8  ;;  %s236_s3 = scalar_lea.sflag [#allocation6], %s235_s2 }
  0x3a   : > { %1722 = sst [smem:[#allocation12 + $0x4]] (%p2246_p5), %s2124_s8  ;;  %s2126_s14 = smov [#allocation11]  }
  0x3b   : > { %s1560_s9 = sshll.u32 %s249_s16, 26  ;;  %1723 = sst [smem:[#allocation12 + $0x5]] (%p2246_p5), %s2125_s11 }
  0x3c   : > { %s1561_s27 = sadd.s32 134217728, %s1560_s9 }
  0x3d   : > { %1724 = dma.general (%p2246_p5), %s258_s15, 2048, %s260_s12, %s236_s3, %s2126_s14, [#allocation12], %s1561_s27, 0  }
  0x3e PF: > { %284 = sbr.rel (%p2267_p13) target bundleno = 541 (0x21d), region = 40  ;;  %s2328_s17 = sand.u32 (!%p2267_p13), 1, %s2105_s19  }
  0x3f   : > { %s1563_s23 = sshll.u32 (!%p2267_p13), %s2328_s17, 4  ;;  %s287_s13 = scalar_lea.sflag (!%p2267_p13), [#allocation3], %s2328_s17 }
  0x40   : > { %s2334_s16 = scalar_lea.vmem (!%p2267_p13), [#allocation2], %s1563_s23 }
  0x43   : > { %2080 = dma.done.wait (%p2252_p6), %s287_s13, 256  }
  0x44   : > { %2082 = vsyncadd (%p2252_p6), %s287_s13, 4294967040  ;;  %s296_s28 = sand.u32 1, %s2228_s22   ;;  %s1564_s7 = sshll.u32 %s2328_s17, 7 }
  0x45   : > { %s297_s2 = scalar_lea.sflag [#allocation6], %s296_s28  ;;  %s2342_s12 = scalar_lea.vmem [#allocation5], %s1564_s7 }
  0x46   : > { %2084 = dma.done.wait (%p2252_p6), %s297_s2, 2048  }
  0x47   : > { %2086 = vsyncadd (%p2252_p6), %s297_s2, 4294965248 }
  0x48   : > { %2088 = dma.done.wait (%p46_p4), [#allocation6], 256  }
  0x49   : > { %2090 = vsyncadd (%p46_p4), [#allocation6], 4294967040 }
  0x4a   : > { %2092 = dma.done.wait (%p46_p4), [#allocation9], 64  }
  0x4b   : > { %2094 = vsyncadd (%p46_p4), [#allocation9], 4294967232  ;;  %v2127_v0 = vmov 1   ;;  %v2128_v1 = vmov 0   ;;  %v2129_v2 = vmov 2   ;;  %v2357_v3 = vld [vmem:[%s2334_s16] sm:$0xff] }
  0x4c   : > { %1844 = vset.pattern.permute.xlu1 %v2127_v0  ;;  %1843 = vset.pattern.permute.xlu0 %v2128_v1  ;;  %v2359_v4 = vld [vmem:[#allocation7 + $0x8] sm:$0xff]  ;;  %v2365_v5 = vld [vmem:[#allocation7] sm:$0xff]  ;;  %vm415_vm0 = vcmask 261120   ;;  %v1697_v9 = vld [vmem:[%s2342_s12 + $0x10] sm:$0xff]  ;;  %v2130_v11 = vmov 3   ;;  %v2131_v12 = vmov 4  }
  0x4d   : > { %1845 = vset.pattern.permute.xlu2 %v2129_v2  ;;  %373 = vperm.xlu1 %1844, %v2357_v3   ;;  %v2372_v6 = vld [vmem:[%s2334_s16 + $0x8] sm:$0xff]  ;;  %v1695_v7 = vld [vmem:[%s2342_s12] sm:$0xff]  ;;  %v2132_v13 = vmov 5   ;;  %v2133_v14 = vmov 6   ;;  %v2134_v15 = vmov 8   ;;  %v2135_v17 = vmov 7  }
  0x4e   : > { %361 = vperm.xlu0 %1843, %v2357_v3   ;;  %425 = vmatpush.bf16.msra.mxu0 %v2359_v4  ;;  %v1696_v8 = vld [vmem:[%s2342_s12 + $0x8] sm:$0xff]  ;;  %v1698_v10 = vld [vmem:[%s2342_s12 + $0x18] sm:$0xff]  ;;  %v1699_v16 = vld [vmem:[%s2342_s12 + $0x20] sm:$0xff]  ;;  %v2136_v18 = vmov 10   ;;  %v2137_v20 = vmov 13   ;;  %v2138_v21 = vmov 9  }
  0x4f   : > { %491 = vmatpush.bf16.msra.mxu1 %v2359_v4  ;;  %386 = vperm.xlu2 %1845, %v2357_v3   ;;  %v1700_v19 = vld [vmem:[%s2342_s12 + $0x28] sm:$0xff]  ;;  %v2139_v22 = vmov 15   ;;  %v1701_v23 = vld [vmem:[%s2342_s12 + $0x30] sm:$0xff]  ;;  %v2140_v24 = vmov 11   ;;  %v2141_v25 = vmov 12   ;;  %v2142_v26 = vmov 18  }
  0x50   : > { %556 = vmatpush.bf16.msra.mxu2 %v2359_v4  ;;  %621 = vmatpush.bf16.msra.mxu3 %v2359_v4  ;;  %v2143_v27 = vmov 14   ;;  %v2144_v30 = vmov 20   ;;  %v2145_v31 = vmov 16   ;;  %v1702_v32 = vld [vmem:[%s2342_s12 + $0x38] sm:$0xff]  ;;  %v2449_v34 = vld [vmem:[#allocation8 + $0x1] ss:$0 sm:$0xff] }
  0x51   : > { %v2451_v35 = vld [vmem:[#allocation8] ss:$0 sm:$0xff]  ;;  %v2453_v36 = vld [vmem:[#allocation8 + $0x2] ss:$0 sm:$0xff]  ;;  %v2146_v41 = vmov 17   ;;  %v1703_v46 = vld [vmem:[%s2342_s12 + $0x40] sm:$0xff] }
  0x52   : > { %426 = vmatpush.bf16.msra.mxu0 %v2365_v5  ;;  %v2147_v49 = vmov 23   ;;  %v2148_v54 = vmov 19   ;;  %v2477_v0 = vld [vmem:[%s2750_s4] ss:$0 sm:$0xff]  ;;  %vm1415_vm1 = vcmask 523264   ;;  %s342_s10 = scalar_lea.vmem [#allocation10], %s1563_s23 }
  0x53   : > { %492 = vmatpush.bf16.msra.mxu1 %v2365_v5  ;;  %s1711_s8 = sshll.u32 %s2228_s22, 4  ;;  %s1431_s3 = sshll.u32 %s342_s10, 4  ;;  %s1432_s3 = int_to_ptr.vmem [resolvable:$true] %s1431_s3 }
  0x54   : > { %557 = vmatpush.bf16.msra.mxu2 %v2365_v5  ;;  %622 = vmatpush.bf16.msra.mxu3 %v2365_v5  ;;  %s1430_s27 = scalar_lea.hbm %s2751_s5, %s1711_s8  ;;  %s1419_s22 = scalar_lea.sflag [#allocation4], %s2328_s17 }
  0x55   : > { %377 = vperm.xlu1 %1844, %v2372_v6   ;;  %1580 = vmatmul.msk.bf16.vlgmr.msra.gmra.mxu0 %vm415_vm0, %v1695_v7  ;;  %s1433_s14 = sshll.u32 %s1430_s27, 4  ;;  %s2055_s7 = scalar_lea.hbm %s2751_s5, 32  ;;  %s1434_s14 = int_to_ptr.hbm [resolvable:$true] %s1433_s14 }
  0x56   : > { %686 = vmatpush.bf16.msrb.mxu0 %v2359_v4  ;;  %366 = vperm.xlu0 %1843, %v2372_v6   ;;  %s2049_s23 = sshra.s32 %s1434_s14, 4  ;;  %s2050_s23 = int_to_ptr.hbm [resolvable:$true] %s2049_s23 }
  0x57   : > { %751 = vmatpush.bf16.msrb.mxu1 %v2359_v4  ;;  %390 = vperm.xlu2 %1845, %v2372_v6   ;;  %s2051_s13 = scalar_lea.hbm %s2050_s23, 16  ;;  %p2056_p13 = scmp.lt.s32.totalorder %s2050_s23, %s2751_s5 }
  0x58   : > { %1587 = vmatmul.msk.bf16.vlgmr.msra.gmra.mxu1 %vm415_vm0, %v1696_v8  ;;  %1594 = vmatmul.msk.bf16.vlgmr.msra.gmra.mxu2 %vm415_vm0, %v1697_v9  ;;  %p2052_p4 = scmp.ne.s32.totalorder %s2050_s23, %s2051_s13  ;;  %p2057_p3 = scmp.lt.s32.totalorder %s2055_s7, %s2051_s13 }
  0x59   : > { %1601 = vmatmul.msk.bf16.vlgmr.msra.gmra.mxu3 %vm415_vm0, %v1698_v10  ;;  %816 = vmatpush.bf16.msrb.mxu2 %v2359_v4 }
  0x5a   : > { %687 = vmatpush.bf16.msrb.mxu0 %v2365_v5  ;;  %881 = vmatpush.bf16.msrb.mxu3 %v2359_v4  ;;  %p2053_p5 = pnand %p2052_p4, %p2259_p11  ;;  %p2058_p7 = por %p2057_p3, %p2056_p13 }
  0x5b   : > { %752 = vmatpush.bf16.msrb.mxu1 %v2365_v5 }
  0x5c   : > { %p2054_p6 = pneg %p2053_p5 }
  0x5d   : > { %1847 = vset.pattern.permute.xlu1 %v2130_v11  ;;  %817 = vmatpush.bf16.msrb.mxu2 %v2365_v5 }
  0x5e   : > { %946 = vmatpush.bf16.msra.mxu0 %v2359_v4  ;;  %1846 = vset.pattern.permute.xlu0 %v2130_v11  ;;  %v2149_v11 = vmov 25   ;;  %p2059_p8 = pnand %p2058_p7, %p2054_p6 }
  0x5f   : > { %1011 = vmatpush.bf16.msra.mxu1 %v2359_v4  ;;  %448 = vperm.xlu1 %1847, %v2372_v6  }
  0x60   : > { %444 = vperm.xlu0 %1846, %v2357_v3   ;;  %1848 = vset.pattern.permute.xlu2 %v2131_v12 }
  0x61   : > { %454 = vperm.xlu2 %1848, %v2357_v3   ;;  %882 = vmatpush.bf16.msrb.mxu3 %v2365_v5 }
  0x62   : > { %947 = vmatpush.bf16.msra.mxu0 %v2365_v5  ;;  %1076 = vmatpush.bf16.msra.mxu2 %v2359_v4 }
  0x63   : > { %1012 = vmatpush.bf16.msra.mxu1 %v2365_v5 }
  0x65   : > { %1141 = vmatpush.bf16.msra.mxu3 %v2359_v4  ;;  %1608 = vmatmul.msk.bf16.vlgmr.msrb.gmra.mxu0 %vm415_vm0, %v1699_v16 }
  0x66   : > { %1077 = vmatpush.bf16.msra.mxu2 %v2365_v5  ;;  %1206 = vmatpush.bf16.msrb.mxu0 %v2359_v4 }
  0x67   : > { %1849 = vset.pattern.permute.xlu1 %v2131_v12 }
  0x68   : > { %1851 = vset.pattern.permute.xlu0 %v2132_v13  ;;  %458 = vperm.xlu1 %1849, %v2372_v6  }
  0x69   : > { %470 = vperm.xlu0 %1851, %v2372_v6   ;;  %1850 = vset.pattern.permute.xlu2 %v2132_v13 }
  0x6a   : > { %466 = vperm.xlu2 %1850, %v2357_v3   ;;  %1142 = vmatpush.bf16.msra.mxu3 %v2365_v5 }
  0x6b   : > { %1207 = vmatpush.bf16.msrb.mxu0 %v2365_v5  ;;  %1615 = vmatmul.msk.bf16.vlgmr.msrb.gmra.mxu1 %vm415_vm0, %v1700_v19 }
  0x6c   : > { %1271 = vmatpush.bf16.msrb.mxu1 %v2359_v4  ;;  %1622 = vmatmul.msk.bf16.vlgmr.msrb.gmra.mxu2 %vm415_vm0, %v1701_v23 }
  0x6d   : > { %1336 = vmatpush.bf16.msrb.mxu2 %v2359_v4  ;;  %1629 = vmatmul.msk.bf16.vlgmr.msrb.gmra.mxu3 %vm415_vm0, %v1702_v32 }
  0x6e   : > { %1401 = vmatpush.bf16.msrb.mxu3 %v2359_v4 }
  0x70   : > { %1852 = vset.pattern.permute.xlu1 %v2133_v14  ;;  %1272 = vmatpush.bf16.msrb.mxu1 %v2365_v5 }
  0x71   : > { %1856 = vset.pattern.permute.xlu0 %v2134_v15  ;;  %509 = vperm.xlu1 %1852, %v2357_v3  }
  0x72   : > { %531 = vperm.xlu0 %1856, %v2357_v3   ;;  %1853 = vset.pattern.permute.xlu2 %v2133_v14 }
  0x73   : > { %513 = vperm.xlu2 %1853, %v2372_v6   ;;  %1337 = vmatpush.bf16.msrb.mxu2 %v2365_v5 }
  0x74   : > { %1402 = vmatpush.bf16.msrb.mxu3 %v2365_v5 }
  0x75   : > { %1636 = vmatmul.msk.bf16.vlgmr.msra.gmra.mxu0 %vm415_vm0, %v1703_v46  ;;  %v2152_v46 = vmov 28  }
  0x79   : > { %1854 = vset.pattern.permute.xlu1 %v2135_v17 }
  0x7a   : > { %1861 = vset.pattern.permute.xlu0 %v2136_v18  ;;  %519 = vperm.xlu1 %1854, %v2357_v3  }
  0x7b   : > { %588 = vperm.xlu0 %1861, %v2372_v6   ;;  %1855 = vset.pattern.permute.xlu2 %v2135_v17 }
  0x7c   : > { %523 = vperm.xlu2 %1855, %v2372_v6  }
  0x82   : > { %1857 = vset.pattern.permute.xlu1 %v2134_v15 }
  0x83   : > { %1866 = vset.pattern.permute.xlu0 %v2137_v20  ;;  %535 = vperm.xlu1 %1857, %v2372_v6  }
  0x84   : > { %649 = vperm.xlu0 %1866, %v2357_v3   ;;  %1858 = vset.pattern.permute.xlu2 %v2138_v21 }
  0x85   : > { %574 = vperm.xlu2 %1858, %v2357_v3  }
  0x8b   : > { %1859 = vset.pattern.permute.xlu1 %v2138_v21  ;;  %v2150_v21 = vmov 21  }
  0x8c   : > { %578 = vperm.xlu1 %1859, %v2372_v6   ;;  %1871 = vset.pattern.permute.xlu0 %v2139_v22 }
  0x8d   : > { %1860 = vset.pattern.permute.xlu2 %v2136_v18  ;;  %708 = vperm.xlu0 %1871, %v2372_v6  }
  0x8e   : > { %584 = vperm.xlu2 %1860, %v2357_v3  }
  0x94   : > { %1862 = vset.pattern.permute.xlu1 %v2140_v24 }
  0x95   : > { %596 = vperm.xlu1 %1862, %v2357_v3   ;;  %1876 = vset.pattern.permute.xlu0 %v2142_v26 }
  0x96   : > { %1863 = vset.pattern.permute.xlu2 %v2140_v24  ;;  %769 = vperm.xlu0 %1876, %v2357_v3  }
  0x97   : > { %600 = vperm.xlu2 %1863, %v2372_v6  }
  0x9d   : > { %1864 = vset.pattern.permute.xlu1 %v2141_v25 }
  0x9e   : > { %639 = vperm.xlu1 %1864, %v2357_v3   ;;  %1881 = vset.pattern.permute.xlu0 %v2144_v30 }
  0x9f   : > { %1865 = vset.pattern.permute.xlu2 %v2141_v25  ;;  %795 = vperm.xlu0 %1881, %v2372_v6  }
  0xa0   : > { %643 = vperm.xlu2 %1865, %v2372_v6  }
  0xa6   : > { %1867 = vset.pattern.permute.xlu1 %v2137_v20 }
  0xa7   : > { %653 = vperm.xlu1 %1867, %v2372_v6   ;;  %1886 = vset.pattern.permute.xlu0 %v2147_v49 }
  0xa8   : > { %1868 = vset.pattern.permute.xlu2 %v2143_v27  ;;  %856 = vperm.xlu0 %1886, %v2357_v3  }
  0xa9   : > { %661 = vperm.xlu2 %1868, %v2357_v3   ;;  %v387_v28 = vpop.permute.xlu2 %386 }
  0xaa   : > { %v394_v42 = vmul.f32 %v2453_v36, %v387_v28 }
  0xaf   : > { %1869 = vset.pattern.permute.xlu1 %v2143_v27 }
  0xb0   : > { %665 = vperm.xlu1 %1869, %v2372_v6   ;;  %1891 = vset.pattern.permute.xlu0 %v2149_v11 }
  0xb1   : > { %1870 = vset.pattern.permute.xlu2 %v2139_v22  ;;  %v391_v29 = vpop.permute.xlu2 %390  ;;  %913 = vperm.xlu0 %1891, %v2372_v6  }
  0xb2   : > { %704 = vperm.xlu2 %1870, %v2357_v3   ;;  %v395_v52 = vmul.f32 %v2453_v36, %v391_v29 }
  0xb8   : > { %1872 = vset.pattern.permute.xlu1 %v2145_v31 }
  0xb9   : > { %714 = vperm.xlu1 %1872, %v2357_v3   ;;  %1896 = vset.pattern.permute.xlu0 %v2152_v46 }
  0xba   : > { %1873 = vset.pattern.permute.xlu2 %v2145_v31  ;;  %974 = vperm.xlu0 %1896, %v2357_v3  }
  0xbb   : > { %718 = vperm.xlu2 %1873, %v2372_v6   ;;  %v455_v33 = vpop.permute.xlu2 %454 }
  0xbc   : > { %v461_v57 = vmul.f32 %v2449_v34, %v455_v33  ;;  %v1704_v33 = vld [vmem:[%s2342_s12 + $0x48] sm:$0xff] }
  0xbd   : > { %1643 = vmatmul.msk.bf16.vlgmr.msra.gmra.mxu1 %vm415_vm0, %v1704_v33 }
  0xbf   : > { %v374_v37 = vpop.permute.xlu1 %373 }
  0xc0   : > { %v362_v38 = vpop.permute.xlu0 %361  ;;  %v381_v39 = vmul.f32 %v2449_v34, %v374_v37 }
  0xc1   : > { %v370_v40 = vmul.f32 %v2451_v35, %v362_v38  ;;  %1874 = vset.pattern.permute.xlu1 %v2146_v41 }
  0xc2   : > { %726 = vperm.xlu1 %1874, %v2357_v3  }
  0xc3   : > { %v383_v43 = vadd.f32 %v381_v39, %v370_v40  ;;  %1875 = vset.pattern.permute.xlu2 %v2146_v41  ;;  %v2151_v39 = vmov 22  }
  0xc4   : > { %730 = vperm.xlu2 %1875, %v2372_v6   ;;  %v467_v44 = vpop.permute.xlu2 %466 }
  0xc5   : > { %v396_v45 = vadd.f32 %v394_v42, %v383_v43  ;;  %v473_v61 = vmul.f32 %v2453_v36, %v467_v44  ;;  %v1705_v43 = vld [vmem:[%s2342_s12 + $0x50] sm:$0xff] }
  0xc6   : > { %1650 = vmatmul.msk.bf16.vlgmr.msra.gmra.mxu2 %vm415_vm0, %v1705_v43 }
  0xc7   : > { %v378_v47 = vpop.permute.xlu1 %377 }
  0xc8   : > { %v367_v48 = vpop.permute.xlu0 %366  ;;  %v382_v50 = vmul.f32 %v2449_v34, %v378_v47 }
  0xc9   : > { %v371_v51 = vmul.f32 %v2451_v35, %v367_v48 }
  0xca   : > { %1877 = vset.pattern.permute.xlu1 %v2142_v26 }
  0xcb   : > { %v384_v53 = vadd.f32 %v382_v50, %v371_v51  ;;  %773 = vperm.xlu1 %1877, %v2372_v6  }
  0xcc   : > { %1878 = vset.pattern.permute.xlu2 %v2148_v54 }
  0xcd   : > { %779 = vperm.xlu2 %1878, %v2357_v3   ;;  %v514_v55 = vpop.permute.xlu2 %513  ;;  %v397_v56 = vadd.f32 %v395_v52, %v384_v53 }
  0xce   : > { %v517_v4 = vmul.f32 %v2451_v35, %v514_v55  ;;  %v2153_v55 = vmov 24  }
  0xd1   : > { %v449_v58 = vpop.permute.xlu1 %448 }
  0xd2   : > { %v445_v59 = vpop.permute.xlu0 %444  ;;  %v428_v63 = vpop.f32.mrf.mxu0  ;;  %v452_v16 = vmul.f32 %v2451_v35, %v449_v58 }
  0xd3   : > { %v451_v60 = vmul.f32 %v2451_v35, %v445_v59  ;;  %1879 = vset.pattern.permute.xlu1 %v2148_v54  ;;  %v429_v2 = vadd.f32 %v428_v63, %v396_v45 }
  0xd4   : > { %783 = vperm.xlu1 %1879, %v2372_v6  }
  0xd5   : > { %v463_v62 = vadd.f32 %v461_v57, %v451_v60  ;;  %v494_v1 = vpop.f32.mrf.mxu1  ;;  %1880 = vset.pattern.permute.xlu2 %v2144_v30  ;;  %v436_v9 = vadd.f32 %v2477_v0, %v429_v2 }
  0xd6   : > { %791 = vperm.xlu2 %1880, %v2357_v3   ;;  %v524_v7 = vpop.permute.xlu2 %523 }
  0xd7   : > { %v475_v5 = vadd.f32 %v473_v61, %v463_v62  ;;  %v527_v8 = vmul.f32 %v2449_v34, %v524_v7  ;;  %v438_v19 = vmax.f32 %v436_v9, 0.0  ;;  %v2154_v9 = vmov 30  }
  0xd8   : > { %1901 = vset.pattern.permute.xlu0 %v2154_v9 }
  0xd9   : > { %v495_v10 = vadd.f32 %v494_v1, %v475_v5  ;;  %v2484_v12 = vadd.f32 %v527_v8, %v517_v4  ;;  %1033 = vperm.xlu0 %1901, %v2372_v6  }
  0xda   : > { %v459_v14 = vpop.permute.xlu1 %458  ;;  %v430_v22 = vpop.f32.mrf.mxu0 }
  0xdb   : > { %v499_v13 = vadd.f32 %v2477_v0, %v495_v10  ;;  %v471_v15 = vpop.permute.xlu0 %470  ;;  %v462_v17 = vmul.f32 %v2449_v34, %v459_v14  ;;  %v431_v24 = vadd.f32 %v430_v22, %v397_v56  ;;  %v559_v53 = vpop.f32.mrf.mxu2 }
  0xdc   : > { %v474_v18 = vmul.f32 %v2453_v36, %v471_v15  ;;  %1882 = vset.pattern.permute.xlu1 %v2150_v21  ;;  %v624_v1 = vpop.f32.mrf.mxu3 }
  0xdd   : > { %v501_v20 = vmax.f32 %v499_v13, 0.0  ;;  %v464_v23 = vadd.f32 %v462_v17, %v452_v16  ;;  %834 = vperm.xlu1 %1882, %v2357_v3   ;;  %v496_v26 = vpop.f32.mrf.mxu1  ;;  %v437_v29 = vadd.f32 %v2477_v0, %v431_v24  ;;  %v2155_v16 = vmov 26  }
  0xde   : > { %1883 = vset.pattern.permute.xlu2 %v2150_v21 }
  0xdf   : > { %v503_v25 = vmax.f32 %v438_v19, %v501_v20  ;;  %v476_v27 = vadd.f32 %v474_v18, %v464_v23  ;;  %838 = vperm.xlu2 %1883, %v2372_v6   ;;  %v575_v28 = vpop.permute.xlu2 %574  ;;  %v439_v37 = vmax.f32 %v437_v29, 0.0  ;;  %v1706_v19 = vld [vmem:[%s2342_s12 + $0x58] sm:$0xff] }
  0xe0   : > { %v581_v41 = vmul.f32 %v2451_v35, %v575_v28  ;;  %1657 = vmatmul.msk.bf16.vlgmr.msra.gmra.mxu3 %vm415_vm0, %v1706_v19 }
  0xe1   : > { %v497_v30 = vadd.f32 %v496_v26, %v476_v27  ;;  %v2156_v27 = vmov 27  }
  0xe3   : > { %v500_v31 = vadd.f32 %v2477_v0, %v497_v30  ;;  %v510_v32 = vpop.permute.xlu1 %509  ;;  %v561_v63 = vpop.f32.mrf.mxu2 }
  0xe4   : > { %v532_v45 = vpop.permute.xlu0 %531  ;;  %v516_v50 = vmul.f32 %v2451_v35, %v510_v32  ;;  %v626_v18 = vpop.f32.mrf.mxu3 }
  0xe5   : > { %v502_v38 = vmax.f32 %v500_v31, 0.0  ;;  %1884 = vset.pattern.permute.xlu1 %v2151_v39  ;;  %v538_v52 = vmul.f32 %v2453_v36, %v532_v45 }
  0xe6   : > { %844 = vperm.xlu1 %1884, %v2357_v3  }
  0xe7   : > { %v504_v40 = vmax.f32 %v439_v37, %v502_v38  ;;  %1885 = vset.pattern.permute.xlu2 %v2151_v39  ;;  %v2157_v37 = vmov 33  }
  0xe8   : > { %848 = vperm.xlu2 %1885, %v2372_v6   ;;  %v585_v42 = vpop.permute.xlu2 %584  ;;  %1906 = vset.pattern.permute.xlu0 %v2157_v37 }
  0xe9   : > { %v591_v44 = vmul.f32 %v2449_v34, %v585_v42  ;;  %1094 = vperm.xlu0 %1906, %v2357_v3  }
  0xeb   : > { %v593_v47 = vadd.f32 %v591_v44, %v581_v41 }
  0xec   : > { %v520_v48 = vpop.permute.xlu1 %519 }
  0xed   : > { %v526_v51 = vmul.f32 %v2449_v34, %v520_v48  ;;  %v589_v5 = vpop.permute.xlu0 %588  ;;  %v2158_v48 = vmov 29  }
  0xee   : > { %1887 = vset.pattern.permute.xlu1 %v2147_v49  ;;  %v592_v10 = vmul.f32 %v2449_v34, %v589_v5  ;;  %v2159_v5 = vmov 35  }
  0xef   : > { %v528_v54 = vadd.f32 %v526_v51, %v516_v50  ;;  %860 = vperm.xlu1 %1887, %v2372_v6  }
  0xf0   : > { %1888 = vset.pattern.permute.xlu2 %v2153_v55 }
  0xf1   : > { %v540_v56 = vadd.f32 %v538_v52, %v528_v54  ;;  %899 = vperm.xlu2 %1888, %v2357_v3   ;;  %v601_v57 = vpop.permute.xlu2 %600  ;;  %v2548_v54 = vpop.f32.mrf.mxu1  ;;  %1911 = vset.pattern.permute.xlu0 %v2159_v5 }
  0xf2   : > { %1120 = vperm.xlu0 %1911, %v2372_v6  }
  0xf3   : > { %v560_v58 = vadd.f32 %v559_v53, %v540_v56 }
  0xf5   : > { %v564_v59 = vadd.f32 %v2477_v0, %v560_v58  ;;  %v536_v60 = vpop.permute.xlu1 %535 }
  0xf6   : > { %v539_v61 = vmul.f32 %v2453_v36, %v536_v60  ;;  %v650_v28 = vpop.permute.xlu0 %649 }
  0xf7   : > { %v566_v62 = vmax.f32 %v564_v59, 0.0  ;;  %1889 = vset.pattern.permute.xlu1 %v2153_v55  ;;  %v656_v38 = vmul.f32 %v2449_v34, %v650_v28 }
  0xf8   : > { %903 = vperm.xlu1 %1889, %v2372_v6   ;;  %v541_v49 = vadd.f32 %v539_v61, %v2484_v12 }
  0xf9   : > { %v568_v2 = vmax.f32 %v503_v25, %v566_v62  ;;  %1890 = vset.pattern.permute.xlu2 %v2149_v11  ;;  %v604_v11 = vmul.f32 %v2453_v36, %v601_v57 }
  0xfa   : > { %v562_v4 = vadd.f32 %v561_v63, %v541_v49  ;;  %909 = vperm.xlu2 %1890, %v2357_v3   ;;  %v2517_v7 = vpop.permute.xlu2 %643 }
  0xfb   : > { %v647_v58 = vmul.f32 %v2451_v35, %v2517_v7 }
  0xfc   : > { %v565_v8 = vadd.f32 %v2477_v0, %v562_v4 }
  0xfe   : > { %v567_v12 = vmax.f32 %v565_v8, 0.0  ;;  %v579_v13 = vpop.permute.xlu1 %578 }
  0xff   : > { %v582_v14 = vmul.f32 %v2451_v35, %v579_v13  ;;  %v709_v43 = vpop.permute.xlu0 %708 }
 0x100   : > { %v569_v15 = vmax.f32 %v504_v40, %v567_v12  ;;  %1892 = vset.pattern.permute.xlu1 %v2155_v16  ;;  %v712_v50 = vmul.f32 %v2451_v35, %v709_v43  ;;  %v2160_v12 = vmov 31  }
 0x101   : > { %v594_v17 = vadd.f32 %v592_v10, %v582_v14  ;;  %921 = vperm.xlu1 %1892, %v2357_v3  }
 0x102   : > { %1893 = vset.pattern.permute.xlu2 %v2155_v16 }
 0x103   : > { %v606_v20 = vadd.f32 %v604_v11, %v594_v17  ;;  %925 = vperm.xlu2 %1893, %v2372_v6   ;;  %v662_v21 = vpop.permute.xlu2 %661 }
 0x104   : > { %v668_v41 = vmul.f32 %v2453_v36, %v662_v21 }
 0x105   : > { %v627_v22 = vadd.f32 %v626_v18, %v606_v20 }
 0x107   : > { %v630_v23 = vadd.f32 %v2477_v0, %v627_v22  ;;  %v597_v24 = vpop.permute.xlu1 %596 }
 0x108   : > { %v603_v25 = vmul.f32 %v2453_v36, %v597_v24  ;;  %v770_v10 = vpop.permute.xlu0 %769 }
 0x109   : > { %v632_v26 = vmax.f32 %v630_v23, 0.0  ;;  %1894 = vset.pattern.permute.xlu1 %v2156_v27  ;;  %v776_v11 = vmul.f32 %v2451_v35, %v770_v10  ;;  %v1707_v23 = vld [vmem:[%s2342_s12 + $0x60] sm:$0xff] }
 0x10a   : > { %v605_v29 = vadd.f32 %v603_v25, %v593_v47  ;;  %964 = vperm.xlu1 %1894, %v2357_v3   ;;  %v689_v47 = vpop.f32.mrf.mxu0  ;;  %1664 = vmatmul.msk.bf16.vlgmr.msrb.gmra.mxu0 %vm415_vm0, %v1707_v23 }
 0x10b   : > { %v2532_v30 = vmax.f32 %v569_v15, %v632_v26  ;;  %1895 = vset.pattern.permute.xlu2 %v2156_v27  ;;  %v2161_v27 = vmov 32  }
 0x10c   : > { %v625_v31 = vadd.f32 %v624_v1, %v605_v29  ;;  %968 = vperm.xlu2 %1895, %v2372_v6   ;;  %v2535_v32 = vpop.permute.xlu2 %704  ;;  %v756_v1 = vpop.f32.mrf.mxu1 }
 0x10d   : > { %v711_v24 = vmul.f32 %v2451_v35, %v2535_v32  ;;  %v819_v32 = vpop.f32.mrf.mxu2 }
 0x10e   : > { %v629_v33 = vadd.f32 %v2477_v0, %v625_v31 }
 0x110   : > { %v631_v39 = vmax.f32 %v629_v33, 0.0  ;;  %v640_v40 = vpop.permute.xlu1 %639 }
 0x111   : > { %v646_v42 = vmul.f32 %v2451_v35, %v640_v40 }
 0x112   : > { %1897 = vset.pattern.permute.xlu1 %v2152_v46  ;;  %v633_v44 = vmax.f32 %v568_v2, %v631_v39  ;;  %v1708_v39 = vld [vmem:[%s2342_s12 + $0x68] sm:$0xff] }
 0x113   : > { %v658_v45 = vadd.f32 %v656_v38, %v646_v42  ;;  %978 = vperm.xlu1 %1897, %v2372_v6   ;;  %1671 = vmatmul.msk.bf16.vlgmr.msrb.gmra.mxu1 %vm415_vm0, %v1708_v39 }
 0x114   : > { %1898 = vset.pattern.permute.xlu2 %v2158_v48 }
 0x115   : > { %v670_v51 = vadd.f32 %v668_v41, %v658_v45  ;;  %986 = vperm.xlu2 %1898, %v2357_v3   ;;  %v719_v52 = vpop.permute.xlu2 %718 }
 0x116   : > { %v722_v53 = vmul.f32 %v2449_v34, %v719_v52 }
 0x117   : > { %v690_v55 = vadd.f32 %v689_v47, %v670_v51 }
 0x118   : > { %v724_v56 = vadd.f32 %v722_v53, %v712_v50 }
 0x119   : > { %v694_v46 = vadd.f32 %v2477_v0, %v690_v55  ;;  %v654_v57 = vpop.permute.xlu1 %653 }
 0x11a   : > { %v657_v59 = vmul.f32 %v2449_v34, %v654_v57  ;;  %v796_v57 = vpop.permute.xlu0 %795 }
 0x11b   : > { %v696_v60 = vmax.f32 %v694_v46, 0.0  ;;  %1899 = vset.pattern.permute.xlu1 %v2158_v48 }
 0x11c   : > { %v659_v61 = vadd.f32 %v657_v59, %v647_v58  ;;  %990 = vperm.xlu1 %1899, %v2372_v6   ;;  %v2164_v58 = vmov 40  }
 0x11d   : > { %v2555_v62 = vmax.f32 %v633_v44, %v696_v60  ;;  %1900 = vset.pattern.permute.xlu2 %v2154_v9  ;;  %v691_v9 = vpop.f32.mrf.mxu0  ;;  %v2163_v44 = vmov 34  }
 0x11e   : > { %1029 = vperm.xlu2 %1900, %v2357_v3   ;;  %v731_v63 = vpop.permute.xlu2 %730 }
 0x11f   : > { %v734_v49 = vmul.f32 %v2453_v36, %v731_v63  ;;  %v799_v63 = vmul.f32 %v2453_v36, %v796_v57 }
 0x121   : > { %v736_v2 = vadd.f32 %v734_v49, %v724_v56  ;;  %v2165_v49 = vmov 36  }
 0x122   : > { %v666_v4 = vpop.permute.xlu1 %665 }
 0x123   : > { %v669_v7 = vmul.f32 %v2453_v36, %v666_v4  ;;  %v757_v8 = vadd.f32 %v756_v1, %v736_v2  ;;  %v821_v2 = vpop.f32.mrf.mxu2  ;;  %v1709_v4 = vld [vmem:[%s2342_s12 + $0x70] sm:$0xff] }
 0x124   : > { %1902 = vset.pattern.permute.xlu1 %v2160_v12  ;;  %1678 = vmatmul.msk.bf16.vlgmr.msrb.gmra.mxu2 %vm415_vm0, %v1709_v4 }
 0x125   : > { %1039 = vperm.xlu1 %1902, %v2357_v3   ;;  %v671_v13 = vadd.f32 %v669_v7, %v659_v61  ;;  %v760_v15 = vadd.f32 %v2477_v0, %v757_v8 }
 0x126   : > { %1903 = vset.pattern.permute.xlu2 %v2160_v12 }
 0x127   : > { %v692_v14 = vadd.f32 %v691_v9, %v671_v13  ;;  %1043 = vperm.xlu2 %1903, %v2372_v6   ;;  %v780_v16 = vpop.permute.xlu2 %779  ;;  %v762_v21 = vmax.f32 %v760_v15, 0.0  ;;  %v2166_v13 = vmov 37  }
 0x128   : > { %v786_v17 = vmul.f32 %v2449_v34, %v780_v16  ;;  %v1710_v16 = vld [vmem:[%s2342_s12 + $0x78] sm:$0xff] }
 0x129   : > { %v695_v18 = vadd.f32 %v2477_v0, %v692_v14  ;;  %1685 = vmatmul.msk.bf16.vlgmr.msrb.gmra.mxu3 %vm415_vm0, %v1710_v16 }
 0x12a   : > { %v788_v19 = vadd.f32 %v786_v17, %v776_v11 }
 0x12b   : > { %v697_v20 = vmax.f32 %v695_v18, 0.0  ;;  %v715_v22 = vpop.permute.xlu1 %714  ;;  %v857_v18 = vpop.permute.xlu0 %856 }
 0x12c   : > { %v721_v25 = vmul.f32 %v2449_v34, %v715_v22 }
 0x12d   : > { %v699_v26 = vmax.f32 %v2532_v30, %v697_v20  ;;  %1904 = vset.pattern.permute.xlu1 %v2161_v27  ;;  %v2162_v30 = vmov 38  }
 0x12e   : > { %v723_v28 = vadd.f32 %v721_v25, %v711_v24  ;;  %1051 = vperm.xlu1 %1904, %v2357_v3   ;;  %1916 = vset.pattern.permute.xlu0 %v2162_v30  ;;  %v863_v24 = vmul.f32 %v2453_v36, %v857_v18  ;;  %v884_v25 = vpop.f32.mrf.mxu3  ;;  %v2173_v18 = vmov 44  }
 0x12f   : > { %v2576_v29 = vmax.f32 %v699_v26, %v762_v21  ;;  %1905 = vset.pattern.permute.xlu2 %v2161_v27  ;;  %1181 = vperm.xlu0 %1916, %v2357_v3   ;;  %v2168_v27 = vmov 39  }
 0x130   : > { %1055 = vperm.xlu2 %1905, %v2372_v6   ;;  %v792_v31 = vpop.permute.xlu2 %791 }
 0x131   : > { %v798_v33 = vmul.f32 %v2453_v36, %v792_v31 }
 0x133   : > { %v800_v38 = vadd.f32 %v798_v33, %v788_v19  ;;  %v2167_v19 = vmov 43  }
 0x134   : > { %v727_v40 = vpop.permute.xlu1 %726 }
 0x135   : > { %v733_v41 = vmul.f32 %v2453_v36, %v727_v40  ;;  %v820_v42 = vadd.f32 %v819_v32, %v800_v38 }
 0x136   : > { %1907 = vset.pattern.permute.xlu1 %v2157_v37  ;;  %v886_v40 = vpop.f32.mrf.mxu3 }
 0x137   : > { %v735_v43 = vadd.f32 %v733_v41, %v723_v28  ;;  %1098 = vperm.xlu1 %1907, %v2372_v6   ;;  %v824_v47 = vadd.f32 %v2477_v0, %v820_v42  ;;  %1921 = vset.pattern.permute.xlu0 %v2164_v58  ;;  %v949_v41 = vpop.f32.mrf.mxu0 }
 0x138   : > { %1908 = vset.pattern.permute.xlu2 %v2163_v44  ;;  %1238 = vperm.xlu0 %1921, %v2372_v6  }
 0x139   : > { %v755_v45 = vadd.f32 %v2548_v54, %v735_v43  ;;  %1104 = vperm.xlu2 %1908, %v2357_v3   ;;  %v839_v48 = vpop.permute.xlu2 %838  ;;  %v826_v52 = vmax.f32 %v824_v47, 0.0 }
 0x13a   : > { %v842_v54 = vmul.f32 %v2451_v35, %v839_v48  ;;  %v2169_v48 = vmov 45  }
 0x13b   : > { %v759_v50 = vadd.f32 %v2477_v0, %v755_v45 }
 0x13d   : > { %v761_v51 = vmax.f32 %v759_v50, 0.0  ;;  %v774_v53 = vpop.permute.xlu1 %773 }
 0x13e   : > { %v777_v61 = vmul.f32 %v2451_v35, %v774_v53 }
 0x13f   : > { %v763_v55 = vmax.f32 %v2555_v62, %v761_v51  ;;  %1909 = vset.pattern.permute.xlu1 %v2163_v44  ;;  %v914_v44 = vpop.permute.xlu0 %913 }
 0x140   : > { %1108 = vperm.xlu1 %1909, %v2372_v6   ;;  %1926 = vset.pattern.permute.xlu0 %v2167_v19  ;;  %v917_v50 = vmul.f32 %v2449_v34, %v914_v44 }
 0x141   : > { %v2593_v37 = vmax.f32 %v763_v55, %v826_v52  ;;  %1910 = vset.pattern.permute.xlu2 %v2159_v5  ;;  %1299 = vperm.xlu0 %1926, %v2357_v3  }
 0x142   : > { %1116 = vperm.xlu2 %1910, %v2357_v3   ;;  %v849_v56 = vpop.permute.xlu2 %848 }
 0x143   : > { %v852_v46 = vmul.f32 %v2449_v34, %v849_v56 }
 0x145   : > { %v854_v59 = vadd.f32 %v852_v46, %v842_v54  ;;  %v2170_v54 = vmov 41   ;;  %v951_v46 = vpop.f32.mrf.mxu0 }
 0x146   : > { %v784_v60 = vpop.permute.xlu1 %783 }
 0x147   : > { %v787_v62 = vmul.f32 %v2449_v34, %v784_v60 }
 0x148   : > { %1912 = vset.pattern.permute.xlu1 %v2165_v49 }
 0x149   : > { %v789_v1 = vadd.f32 %v787_v62, %v777_v61  ;;  %1159 = vperm.xlu1 %1912, %v2357_v3   ;;  %1931 = vset.pattern.permute.xlu0 %v2169_v48 }
 0x14a   : > { %1913 = vset.pattern.permute.xlu2 %v2165_v49  ;;  %1358 = vperm.xlu0 %1931, %v2372_v6   ;;  %v2171_v49 = vmov 42  }
 0x14b   : > { %v801_v5 = vadd.f32 %v799_v63, %v789_v1  ;;  %1163 = vperm.xlu2 %1913, %v2372_v6   ;;  %v900_v7 = vpop.permute.xlu2 %899 }
 0x14c   : > { %v906_v14 = vmul.f32 %v2451_v35, %v900_v7 }
 0x14d   : > { %v822_v8 = vadd.f32 %v821_v2, %v801_v5  ;;  %v2641_v2 = vld [vmem:[%s2334_s16] sm:$0xff]  ;;  %v975_v5 = vpop.permute.xlu0 %974 }
 0x14f   : > { %v825_v10 = vadd.f32 %v2477_v0, %v822_v8  ;;  %v835_v12 = vpop.permute.xlu1 %834 }
 0x150   : > { %v841_v22 = vmul.f32 %v2451_v35, %v835_v12  ;;  %v981_v12 = vmul.f32 %v2449_v34, %v975_v5 }
 0x151   : > { %v827_v9 = vmax.f32 %v825_v10, 0.0  ;;  %1914 = vset.pattern.permute.xlu1 %v2166_v13  ;;  %v2172_v10 = vmov 47  }
 0x152   : > { %1169 = vperm.xlu1 %1914, %v2357_v3   ;;  %1936 = vset.pattern.permute.xlu0 %v2172_v10 }
 0x153   : > { %v829_v11 = vmax.f32 %v2576_v29, %v827_v9  ;;  %1915 = vset.pattern.permute.xlu2 %v2166_v13 }
 0x154   : > { %1173 = vperm.xlu2 %1915, %v2372_v6   ;;  %v910_v15 = vpop.permute.xlu2 %909 }
 0x155   : > { %v916_v17 = vmul.f32 %v2449_v34, %v910_v15 }
 0x157   : > { %v918_v20 = vadd.f32 %v916_v17, %v906_v14  ;;  %v1942_v17 = vld [vmem:[%s2334_s16 + $0x8] sm:$0xff] }
 0x158   : > { %v845_v21 = vpop.permute.xlu1 %844 }
 0x159   : > { %v851_v23 = vmul.f32 %v2449_v34, %v845_v21 }
 0x15a   : > { %1917 = vset.pattern.permute.xlu1 %v2162_v30 }
 0x15b   : > { %v853_v26 = vadd.f32 %v851_v23, %v841_v22  ;;  %1185 = vperm.xlu1 %1917, %v2372_v6   ;;  %v1079_v22 = vpop.f32.mrf.mxu2  ;;  %v1034_v23 = vpop.permute.xlu0 %1033 }
 0x15c   : > { %1918 = vset.pattern.permute.xlu2 %v2168_v27 }
 0x15d   : > { %v865_v28 = vadd.f32 %v863_v24, %v853_v26  ;;  %1224 = vperm.xlu2 %1918, %v2357_v3   ;;  %v926_v29 = vpop.permute.xlu2 %925 }
 0x15e   : > { %v929_v53 = vmul.f32 %v2453_v36, %v926_v29 }
 0x15f   : > { %v885_v31 = vadd.f32 %v884_v25, %v865_v28 }
 0x161   : > { %v889_v33 = vadd.f32 %v2477_v0, %v885_v31  ;;  %v861_v32 = vpop.permute.xlu1 %860 }
 0x162   : > { %v864_v38 = vmul.f32 %v2453_v36, %v861_v32 }
 0x163   : > { %v891_v39 = vmax.f32 %v889_v33, 0.0  ;;  %1919 = vset.pattern.permute.xlu1 %v2168_v27 }
 0x164   : > { %1228 = vperm.xlu1 %1919, %v2372_v6   ;;  %v866_v30 = vadd.f32 %v864_v38, %v854_v59 }
 0x165   : > { %v893_v42 = vmax.f32 %v2593_v37, %v891_v39  ;;  %1920 = vset.pattern.permute.xlu2 %v2164_v58 }
 0x166   : > { %v887_v43 = vadd.f32 %v886_v40, %v866_v30  ;;  %1234 = vperm.xlu2 %1920, %v2357_v3   ;;  %v969_v45 = vpop.permute.xlu2 %968  ;;  %v1081_v30 = vpop.f32.mrf.mxu2 }
 0x167   : > { %v972_v28 = vmul.f32 %v2451_v35, %v969_v45  ;;  %v2174_v45 = vmov 46  }
 0x168   : > { %v890_v47 = vadd.f32 %v2477_v0, %v887_v43 }
 0x16a   : > { %v892_v51 = vmax.f32 %v890_v47, 0.0  ;;  %v904_v52 = vpop.permute.xlu1 %903 }
 0x16b   : > { %v907_v55 = vmul.f32 %v2451_v35, %v904_v52 }
 0x16c   : > { %v894_v37 = vmax.f32 %v829_v11, %v892_v51  ;;  %1922 = vset.pattern.permute.xlu1 %v2170_v54 }
 0x16d   : > { %v919_v56 = vadd.f32 %v917_v50, %v907_v55  ;;  %1246 = vperm.xlu1 %1922, %v2357_v3  }
 0x16e   : > { %1923 = vset.pattern.permute.xlu2 %v2170_v54 }
 0x16f   : > { %v931_v57 = vadd.f32 %v929_v53, %v919_v56  ;;  %1250 = vperm.xlu2 %1923, %v2372_v6   ;;  %v987_v58 = vpop.permute.xlu2 %986  ;;  %v1095_v53 = vpop.permute.xlu0 %1094 }
 0x170   : > { %v993_v11 = vmul.f32 %v2453_v36, %v987_v58 }
 0x171   : > { %v952_v59 = vadd.f32 %v951_v46, %v931_v57  ;;  %v1101_v57 = vmul.f32 %v2451_v35, %v1095_v53 }
 0x173   : > { %v955_v60 = vadd.f32 %v2477_v0, %v952_v59  ;;  %v922_v61 = vpop.permute.xlu1 %921 }
 0x174   : > { %v928_v62 = vmul.f32 %v2453_v36, %v922_v61 }
 0x175   : > { %v957_v63 = vmax.f32 %v955_v60, 0.0  ;;  %1924 = vset.pattern.permute.xlu1 %v2171_v49 }
 0x176   : > { %v930_v1 = vadd.f32 %v928_v62, %v918_v20  ;;  %1289 = vperm.xlu1 %1924, %v2641_v2  }
 0x177   : > { %v2644_v3 = vmax.f32 %v894_v37, %v957_v63  ;;  %1925 = vset.pattern.permute.xlu2 %v2171_v49 }
 0x178   : > { %v950_v4 = vadd.f32 %v949_v41, %v930_v1  ;;  %1293 = vperm.xlu2 %1925, %v2372_v6   ;;  %v1030_v7 = vpop.permute.xlu2 %1029  ;;  %v1014_v6 = vpop.f32.mrf.mxu1 }
 0x179   : > { %v1036_v58 = vmul.f32 %v2451_v35, %v1030_v7 }
 0x17a   : > { %v954_v8 = vadd.f32 %v2477_v0, %v950_v4  ;;  %v1144_v4 = vpop.f32.mrf.mxu3 }
 0x17c   : > { %v956_v9 = vmax.f32 %v954_v8, 0.0  ;;  %v965_v13 = vpop.permute.xlu1 %964 }
 0x17d   : > { %v971_v14 = vmul.f32 %v2451_v35, %v965_v13 }
 0x17e   : > { %1927 = vset.pattern.permute.xlu1 %v2167_v19  ;;  %v958_v15 = vmax.f32 %v893_v42, %v956_v9  ;;  %v1037_v19 = vmul.f32 %v2451_v35, %v1034_v23 }
 0x17f   : > { %v983_v16 = vadd.f32 %v981_v12, %v971_v14  ;;  %1303 = vperm.xlu1 %1927, %v1942_v17  }
 0x180   : > { %1928 = vset.pattern.permute.xlu2 %v2173_v18  ;;  %v1016_v47 = vpop.f32.mrf.mxu1 }
 0x181   : > { %v995_v20 = vadd.f32 %v993_v11, %v983_v16  ;;  %1311 = vperm.xlu2 %1928, %v2641_v2   ;;  %v1044_v21 = vpop.permute.xlu2 %1043 }
 0x182   : > { %v1047_v27 = vmul.f32 %v2449_v34, %v1044_v21 }
 0x183   : > { %v1015_v24 = vadd.f32 %v1014_v6, %v995_v20 }
 0x184   : > { %v1049_v38 = vadd.f32 %v1047_v27, %v1037_v19 }
 0x185   : > { %v1019_v25 = vadd.f32 %v2477_v0, %v1015_v24  ;;  %v979_v26 = vpop.permute.xlu1 %978 }
 0x186   : > { %v982_v29 = vmul.f32 %v2449_v34, %v979_v26 }
 0x187   : > { %v1021_v31 = vmax.f32 %v1019_v25, 0.0  ;;  %1929 = vset.pattern.permute.xlu1 %v2173_v18  ;;  %v1121_v18 = vpop.permute.xlu0 %1120  ;;  %v1146_v25 = vpop.f32.mrf.mxu3 }
 0x188   : > { %v984_v33 = vadd.f32 %v982_v29, %v972_v28  ;;  %1315 = vperm.xlu1 %1929, %v1942_v17   ;;  %v1124_v24 = vmul.f32 %v2453_v36, %v1121_v18 }
 0x189   : > { %v1023_v32 = vmax.f32 %v958_v15, %v1021_v31  ;;  %1930 = vset.pattern.permute.xlu2 %v2169_v48 }
 0x18a   : > { %1354 = vperm.xlu2 %1930, %v2641_v2   ;;  %v1056_v39 = vpop.permute.xlu2 %1055 }
 0x18b   : > { %v1059_v40 = vmul.f32 %v2453_v36, %v1056_v39 }
 0x18d   : > { %v1061_v41 = vadd.f32 %v1059_v40, %v1049_v38 }
 0x18e   : > { %v991_v42 = vpop.permute.xlu1 %990 }
 0x18f   : > { %v994_v43 = vmul.f32 %v2453_v36, %v991_v42  ;;  %v1082_v44 = vadd.f32 %v1081_v30, %v1061_v41  ;;  %v1209_v42 = vpop.f32.mrf.mxu0 }
 0x190   : > { %1932 = vset.pattern.permute.xlu1 %v2174_v45 }
 0x191   : > { %1364 = vperm.xlu1 %1932, %v2641_v2   ;;  %v996_v50 = vadd.f32 %v994_v43, %v984_v33  ;;  %v1085_v48 = vadd.f32 %v2477_v0, %v1082_v44 }
 0x192   : > { %1933 = vset.pattern.permute.xlu2 %v2174_v45 }
 0x193   : > { %v1017_v51 = vadd.f32 %v1016_v47, %v996_v50  ;;  %1368 = vperm.xlu2 %1933, %v1942_v17   ;;  %v1105_v52 = vpop.permute.xlu2 %1104  ;;  %v1087_v54 = vmax.f32 %v1085_v48, 0.0 }
 0x194   : > { %v1111_v46 = vmul.f32 %v2449_v34, %v1105_v52 }
 0x195   : > { %v1020_v55 = vadd.f32 %v2477_v0, %v1017_v51 }
 0x196   : > { %v1113_v63 = vadd.f32 %v1111_v46, %v1101_v57 }
 0x197   : > { %v1022_v37 = vmax.f32 %v1020_v55, 0.0  ;;  %v1040_v56 = vpop.permute.xlu1 %1039 }
 0x198   : > { %v1046_v59 = vmul.f32 %v2449_v34, %v1040_v56 }
 0x199   : > { %v1024_v60 = vmax.f32 %v2644_v3, %v1022_v37  ;;  %1934 = vset.pattern.permute.xlu1 %v2172_v10 }
 0x19a   : > { %v1048_v61 = vadd.f32 %v1046_v59, %v1036_v58  ;;  %1376 = vperm.xlu1 %1934, %v2641_v2  }
 0x19b   : > { %v1089_v62 = vmax.f32 %v1024_v60, %v1087_v54  ;;  %1935 = vset.pattern.permute.xlu2 %v2172_v10  ;;  %v1211_v54 = vpop.f32.mrf.mxu0 }
 0x19c   : > { %1380 = vperm.xlu2 %1935, %v1942_v17   ;;  %v1117_v49 = vpop.permute.xlu2 %1116 }
 0x19d   : > { %v1123_v1 = vmul.f32 %v2453_v36, %v1117_v49 }
 0x19f   : > { %v1125_v5 = vadd.f32 %v1123_v1, %v1113_v63 }
 0x1a0   : > { %v1052_v7 = vpop.permute.xlu1 %1051 }
 0x1a1   : > { %v1058_v8 = vmul.f32 %v2453_v36, %v1052_v7  ;;  %v1145_v12 = vadd.f32 %v1144_v4, %v1125_v5  ;;  %v1182_v38 = vpop.permute.xlu0 %1181 }
 0x1a2   : > { %v1188_v41 = vmul.f32 %v2453_v36, %v1182_v38 }
 0x1a3   : > { %v1060_v3 = vadd.f32 %v1058_v8, %v1048_v61  ;;  %v1149_v13 = vadd.f32 %v2477_v0, %v1145_v12 }
 0x1a5   : > { %v1080_v9 = vadd.f32 %v1079_v22, %v1060_v3  ;;  %v1164_v11 = vpop.permute.xlu2 %1163  ;;  %v1151_v15 = vmax.f32 %v1149_v13, 0.0  ;;  %v1274_v3 = vpop.f32.mrf.mxu1 }
 0x1a6   : > { %v1167_v47 = vmul.f32 %v2451_v35, %v1164_v11 }
 0x1a7   : > { %v1084_v2 = vadd.f32 %v2477_v0, %v1080_v9 }
 0x1a9   : > { %v1086_v14 = vmax.f32 %v1084_v2, 0.0  ;;  %v1099_v10 = vpop.permute.xlu1 %1098 }
 0x1aa   : > { %v1102_v21 = vmul.f32 %v2451_v35, %v1099_v10  ;;  %v1239_v4 = vpop.permute.xlu0 %1238 }
 0x1ab   : > { %v1088_v16 = vmax.f32 %v1023_v32, %v1086_v14 }
 0x1ac   : > { %v1404_v18 = vpop.f32.mrf.mxu3 }
 0x1ad   : > { %v1153_v17 = vmax.f32 %v1088_v16, %v1151_v15  ;;  %v1945_v16 = vld [vmem:[#allocation8 + $0x1] ss:$0 sm:$0xff] }
 0x1ae   : > { %v1174_v6 = vpop.permute.xlu2 %1173 }
 0x1af   : > { %v1177_v50 = vmul.f32 %v2449_v34, %v1174_v6 }
 0x1b1   : > { %v1179_v53 = vadd.f32 %v1177_v50, %v1167_v47 }
 0x1b2   : > { %v1109_v20 = vpop.permute.xlu1 %1108 }
 0x1b3   : > { %v1112_v23 = vmul.f32 %v2449_v34, %v1109_v20  ;;  %v1300_v2 = vpop.permute.xlu0 %1299 }
 0x1b4   : > { %v1406_v38 = vpop.f32.mrf.mxu3  ;;  %v1306_v50 = vmul.f32 %v1945_v16, %v1300_v2 }
 0x1b5   : > { %v1114_v22 = vadd.f32 %v1112_v23, %v1102_v21 }
 0x1b7   : > { %v1126_v26 = vadd.f32 %v1124_v24, %v1114_v22  ;;  %v1225_v27 = vpop.permute.xlu2 %1224 }
 0x1b8   : > { %v1231_v49 = vmul.f32 %v2451_v35, %v1225_v27  ;;  %v1276_v27 = vpop.f32.mrf.mxu1 }
 0x1b9   : > { %v1147_v19 = vadd.f32 %v1146_v25, %v1126_v26 }
 0x1bb   : > { %v1150_v28 = vadd.f32 %v2477_v0, %v1147_v19  ;;  %v1160_v29 = vpop.permute.xlu1 %1159  ;;  %v1339_v19 = vpop.f32.mrf.mxu2 }
 0x1bc   : > { %v1166_v40 = vmul.f32 %v2451_v35, %v1160_v29  ;;  %v1944_v35 = vld [vmem:[#allocation8] ss:$0 sm:$0xff]  ;;  %v1359_v20 = vpop.permute.xlu0 %1358 }
 0x1bd   : > { %v1152_v31 = vmax.f32 %v1150_v28, 0.0  ;;  %v1362_v25 = vmul.f32 %v1944_v35, %v1359_v20 }
 0x1bf   : > { %v1154_v33 = vmax.f32 %v1089_v62, %v1152_v31 }
 0x1c0   : > { %v1235_v32 = vpop.permute.xlu2 %1234 }
 0x1c1   : > { %v1241_v1 = vmul.f32 %v2449_v34, %v1235_v32 }
 0x1c3   : > { %v1243_v7 = vadd.f32 %v1241_v1, %v1231_v49 }
 0x1c4   : > { %v1170_v39 = vpop.permute.xlu1 %1169 }
 0x1c5   : > { %v1176_v30 = vmul.f32 %v2449_v34, %v1170_v39 }
 0x1c7   : > { %v1178_v43 = vadd.f32 %v1176_v30, %v1166_v40 }
 0x1c9   : > { %v1190_v44 = vadd.f32 %v1188_v41, %v1178_v43  ;;  %v1251_v45 = vpop.permute.xlu2 %1250 }
 0x1cb   : > { %v1210_v51 = vadd.f32 %v1209_v42, %v1190_v44 }
 0x1cd   : > { %v1214_v48 = vadd.f32 %v2477_v0, %v1210_v51  ;;  %v1186_v52 = vpop.permute.xlu1 %1185 }
 0x1ce   : > { %v1189_v55 = vmul.f32 %v2453_v36, %v1186_v52  ;;  %v2693_v36 = vld [vmem:[#allocation8 + $0x2] ss:$0 sm:$0xff] }
 0x1cf   : > { %v1216_v37 = vmax.f32 %v1214_v48, 0.0  ;;  %v1254_v21 = vmul.f32 %v2693_v36, %v1251_v45  ;;  %v1341_v45 = vpop.f32.mrf.mxu2 }
 0x1d0   : > { %v1191_v56 = vadd.f32 %v1189_v55, %v1179_v53  ;;  %v1946_v53 = vld [vmem:[%s2750_s4] ss:$0 sm:$0xff] }
 0x1d1   : > { %v1218_v46 = vmax.f32 %v1153_v17, %v1216_v37  ;;  %v1242_v17 = vmul.f32 %v1945_v16, %v1239_v4 }
 0x1d2   : > { %v1212_v57 = vadd.f32 %v1211_v54, %v1191_v56  ;;  %v1294_v58 = vpop.permute.xlu2 %1293 }
 0x1d3   : > { %v1297_v39 = vmul.f32 %v1944_v35, %v1294_v58 }
 0x1d4   : > { %v1215_v59 = vadd.f32 %v2477_v0, %v1212_v57 }
 0x1d6   : > { %v1217_v60 = vmax.f32 %v1215_v59, 0.0  ;;  %v1229_v61 = vpop.permute.xlu1 %1228 }
 0x1d7   : > { %v1232_v34 = vmul.f32 %v1944_v35, %v1229_v61 }
 0x1d8   : > { %v1219_v62 = vmax.f32 %v1154_v33, %v1217_v60 }
 0x1d9   : > { %v1244_v23 = vadd.f32 %v1242_v17, %v1232_v34 }
 0x1db   : > { %v1312_v63 = vpop.permute.xlu2 %1311  ;;  %v1256_v26 = vadd.f32 %v1254_v21, %v1244_v23 }
 0x1dc   : > { %v1318_v37 = vmul.f32 %v2693_v36, %v1312_v63 }
 0x1dd   : > { %v1277_v31 = vadd.f32 %v1276_v27, %v1256_v26 }
 0x1df   : > { %v1247_v5 = vpop.permute.xlu1 %1246  ;;  %v1280_v41 = vadd.f32 %v2477_v0, %v1277_v31 }
 0x1e0   : > { %v1253_v8 = vmul.f32 %v2693_v36, %v1247_v5 }
 0x1e1   : > { %v1282_v48 = vmax.f32 %v1280_v41, 0.0 }
 0x1e2   : > { %v1255_v12 = vadd.f32 %v1253_v8, %v1243_v7 }
 0x1e3   : > { %v1284_v56 = vmax.f32 %v1219_v62, %v1282_v48 }
 0x1e4   : > { %v1275_v9 = vadd.f32 %v1274_v3, %v1255_v12  ;;  %v1355_v13 = vpop.permute.xlu2 %1354 }
 0x1e5   : > { %v1361_v4 = vmul.f32 %v1944_v35, %v1355_v13 }
 0x1e6   : > { %v1279_v11 = vadd.f32 %v2477_v0, %v1275_v9 }
 0x1e8   : > { %v1281_v14 = vmax.f32 %v1279_v11, 0.0  ;;  %v1290_v15 = vpop.permute.xlu1 %1289 }
 0x1e9   : > { %v1296_v47 = vmul.f32 %v1944_v35, %v1290_v15 }
 0x1ea   : > { %v2697_v10 = vmax.f32 %v1218_v46, %v1281_v14 }
 0x1eb   : > { %v1308_v54 = vadd.f32 %v1306_v50, %v1296_v47 }
 0x1ed   : > { %v1369_v6 = vpop.permute.xlu2 %1368  ;;  %v1320_v59 = vadd.f32 %v1318_v37, %v1308_v54 }
 0x1ee   : > { %v1372_v22 = vmul.f32 %v1945_v16, %v1369_v6 }
 0x1ef   : > { %v1340_v49 = vadd.f32 %v1339_v19, %v1320_v59 }
 0x1f0   : > { %v1374_v28 = vadd.f32 %v1372_v22, %v1362_v25 }
 0x1f1   : > { %v1304_v24 = vpop.permute.xlu1 %1303  ;;  %v1344_v63 = vadd.f32 %v1946_v53, %v1340_v49 }
 0x1f2   : > { %v1307_v33 = vmul.f32 %v1945_v16, %v1304_v24 }
 0x1f3   : > { %v1346_v12 = vmax.f32 %v1344_v63, 0.0 }
 0x1f4   : > { %v1309_v42 = vadd.f32 %v1307_v33, %v1297_v39 }
 0x1f5   : > { %v1348_v13 = vmax.f32 %v2697_v10, %v1346_v12 }
 0x1f6   : > { %v1381_v29 = vpop.permute.xlu2 %1380 }
 0x1f7   : > { %v1384_v32 = vmul.f32 %v2693_v36, %v1381_v29 }
 0x1f9   : > { %v1386_v40 = vadd.f32 %v1384_v32, %v1374_v28 }
 0x1fa   : > { %v1316_v30 = vpop.permute.xlu1 %1315 }
 0x1fb   : > { %v1319_v43 = vmul.f32 %v2693_v36, %v1316_v30  ;;  %v1407_v44 = vadd.f32 %v1406_v38, %v1386_v40 }
 0x1fd   : > { %v1321_v51 = vadd.f32 %v1319_v43, %v1309_v42  ;;  %v1410_v55 = vadd.f32 %v1946_v53, %v1407_v44 }
 0x1ff   : > { %v1342_v52 = vadd.f32 %v1341_v45, %v1321_v51  ;;  %v1412_v57 = vmax.f32 %v1410_v55, 0.0 }
 0x201   : > { %v1345_v0 = vadd.f32 %v1946_v53, %v1342_v52 }
 0x203   : > { %v1347_v46 = vmax.f32 %v1345_v0, 0.0  ;;  %v1365_v58 = vpop.permute.xlu1 %1364 }
 0x204   : > { %v1371_v1 = vmul.f32 %v1945_v16, %v1365_v58 }
 0x205   : > { %v1349_v60 = vmax.f32 %v1284_v56, %v1347_v46 }
 0x206   : > { %v1373_v7 = vadd.f32 %v1371_v1, %v1361_v4 }
 0x207   : > { %v1414_v61 = vmax.f32 %v1349_v60, %v1412_v57 }
 0x209   : > { %1417 = vst.msk [vmem:[%s342_s10 + $0x8] sm:$0xff] %vm1415_vm1, %v1414_v61 }
 0x20c   : > { %v1377_v5 = vpop.permute.xlu1 %1376 }
 0x20d   : > { %v1383_v62 = vmul.f32 %v2693_v36, %v1377_v5 }
 0x20f   : > { %v1385_v8 = vadd.f32 %v1383_v62, %v1373_v7 }
 0x211   : > { %v1405_v3 = vadd.f32 %v1404_v18, %v1385_v8 }
 0x213   : > { %v1409_v9 = vadd.f32 %v1946_v53, %v1405_v3 }
 0x215   : > { %v1411_v11 = vmax.f32 %v1409_v9, 0.0 }
 0x217   : > { %v1413_v2 = vmax.f32 %v1348_v13, %v1411_v11 }
 0x219   : > { %1416 = vst.msk [vmem:[%s342_s10] sm:$0xff] %vm1415_vm1, %v1413_v2 }
 0x21a   : > { %2062 = shalt.err (!%p2059_p8)
}
 0x21b   : > { %s2175_s17 = smov 128   ;;  %s2176_s29 = smov 8  }
 0x21c   : > { %1731 = dma.vmem_to_hbm [thread:$0]  (%p2259_p11), %s1432_s3, 256, %s1434_s14, %s1419_s22, %s2175_s17, %s2175_s17, %s2176_s29  }
 0x21d PF: > { %s1448_s15 = sand.u32 1, %s2101_s18   ;;  %p1741_p9 = pnand %p1553_p2, %p2263_p12 }
 0x21e   : > { %s1449_s25 = scalar_lea.sflag [#allocation4], %s1448_s15 }
 0x21f   : > { %p1742_p10 = pneg %p1741_p9 }
 0x221   : > { %2096 = dma.done.wait (%p1742_p10), %s1449_s25, 256  }
 0x222   : > { %2098 = vsyncadd (%p1742_p10), %s1449_s25, 4294967040  ;;  %s2762_s26 = sld [smem:[#allocation19_spill]]  ;;  %p22_p1 = scmp.ge.s32.totalorder %s2232_s24, 4  }
 0x223   : > { %s2763_s18 = smov %s2105_s19  ;;  %s2764_s19 = smov %s2109_s20 }
 0x224   : > { %s2766_s21 = smov %s2232_s24  ;;  %24 = sbr.rel (!%p22_p1) target bundleno = 11 (0xb), region = 126 }
 0x228   : > { %s2765_s20 = smov %s2762_s26 }
 0x229   :  { %1455 = vsyncpa [#allocation3], 1 }
 0x22a   :  { %1457 = vsyncpa [#allocation3 + $0x1], 1 }
 0x22b   :  { %1458 = vsyncpa [#allocation6], 1 }
 0x22c   :  { %1460 = vsyncpa [#allocation6 + $0x1], 1 }
 0x22d   :  { %1461 = vsyncpa [#allocation9], 1 }
 0x22e   :  { %1462 = vsyncpa [#allocation4], 1 }
 0x22f   :  { %1464 = vsyncpa [#allocation4 + $0x1], 1 }

</bundles_post_ra>
